<compile_context>
chip_gen: v5e
topology: v5e:2x2
jax: 0.10.0
libtpu: 0.0.40
codegen_flags: <defaults>
</compile_context>

<pallas_src>
import math
import functools

import jax
import jax.numpy as jnp
from jax import lax
from jax.experimental import pallas as pl
from jax.experimental.pallas import tpu as pltpu

EPS = 1e-5  # torch.nn.LayerNorm default

_BF16_NAMES = {"ip_w1", "ip_w2", "wq", "wk", "wv", "wo", "wr",
               "gw1", "gw2", "ew1", "ew2"}
_EXPERT_NAMES = {"ew1", "eb1", "ew2", "eb2"}
_WEIGHT_ORDER = [
    "ip_ln_g", "ip_ln_b", "ip_w1", "ip_b1", "ip_w2", "ip_b2",
    "pe",
    "wq", "bq", "wk", "bk", "wv", "bv", "wo", "bo",
    "wr", "br", "temp",
    "ew1", "eb1", "ew2", "eb2",
    "g_ln_g", "g_ln_b", "gw1", "gb1", "gw2", "gb2",
    "f_ln_g", "f_ln_b",
]


def _ln(x, g, b):
    mu = jnp.mean(x, axis=-1, keepdims=True)
    var = jnp.mean((x - mu) ** 2, axis=-1, keepdims=True)
    return (x - mu) * lax.rsqrt(var + EPS) * g + b


def _gelu(x):
    # exact (erf-based) GELU, matching torch.nn.GELU default
    return 0.5 * x * (1.0 + lax.erf(x * (1.0 / math.sqrt(2.0))))


def _softmax(x):
    m = jnp.max(x, axis=-1, keepdims=True)
    e = jnp.exp(x - m)
    # EUP approx reciprocal: separate VLIW slot, off the VALU critical path.
    return e * pl.reciprocal(jnp.sum(e, axis=-1, keepdims=True), approx=True)


def _expert_net_kernel(num_heads,
                       # inputs
                       x_ref,
                       ip_ln_g, ip_ln_b, ip_w1, ip_b1, ip_w2, ip_b2,
                       pe_ref,
                       wq, bq, wk, bk, wv, bv, wo, bo,
                       wr, br, temp_ref,
                       ew1, eb1, ew2, eb2,
                       g_ln_g, g_ln_b, gw1, gb1, gw2, gb2,
                       f_ln_g, f_ln_b,
                       # output
                       o_ref,
                       # scratch (persist across the expert axis)
                       x_sc, xbf_sc, g_sc, sc_sc, acc_sc):
    e_idx = pl.program_id(1)
    n_exp = pl.num_programs(1)
    TB, S, D = x_ref.shape
    T = TB * S

    # ------------------------------------------------------------------ e == 0
    # Shared pre-compute for this token tile: input_proj -> +residual -> PE ->
    # domain attention -> router scores -> gate.  Stashed in VMEM scratch.
    @pl.when(e_idx == 0)
    def _precompute():
        x = x_ref[...].reshape(T, D)                       # fold tokens: (T, D)
        residual = x

        # ---- input_proj: LN -> Linear(D,2D) -> GELU -> Dropout(eval) -> Linear(2D,D)
        h = _ln(x, ip_ln_g[...], ip_ln_b[...])
        h = _gelu(jnp.dot(h.astype(jnp.bfloat16), ip_w1[...],
                          preferred_element_type=jnp.float32) + ip_b1[...])
        h = jnp.dot(h.astype(jnp.bfloat16), ip_w2[...],
                    preferred_element_type=jnp.float32) + ip_b2[...]
        x = h + residual

        # ---- positional encoding
        # TODO(synk): HybridPositionalEncoding source not provided; learned additive PE assumed.
        x = (x.reshape(TB, S, D) + pe_ref[...][None, :, :]).reshape(T, D)

        # ---- domain attention
        # TODO(synk): DomainSpecificAttention source not provided; standard unmasked MHA assumed.
        xbf = x.astype(jnp.bfloat16)
        q = (jnp.dot(xbf, wq[...], preferred_element_type=jnp.float32)
             + bq[...]).astype(jnp.bfloat16)
        k = (jnp.dot(xbf, wk[...], preferred_element_type=jnp.float32)
             + bk[...]).astype(jnp.bfloat16)
        v = (jnp.dot(xbf, wv[...], preferred_element_type=jnp.float32)
             + bv[...]).astype(jnp.bfloat16)

        dh = D // num_heads
        scale = 1.0 / math.sqrt(dh)
        rows = []
        for b in range(TB):                                 # per-sequence attention
            qb = q[b * S:(b + 1) * S]
            kb = k[b * S:(b + 1) * S]
            vb = v[b * S:(b + 1) * S]
            if num_heads == 1:
                s = jnp.einsum('qd,kd->qk', qb, kb,
                               preferred_element_type=jnp.float32) * scale
                p = _softmax(s)
                ob = jnp.dot(p.astype(jnp.bfloat16), vb,
                             preferred_element_type=jnp.float32)
            else:
                qh = jnp.swapaxes(qb.reshape(S, num_heads, dh), 0, 1)   # (H,S,dh)
                kh = jnp.swapaxes(kb.reshape(S, num_heads, dh), 0, 1)
                vh = jnp.swapaxes(vb.reshape(S, num_heads, dh), 0, 1)
                s = jnp.einsum('hqd,hkd->hqk', qh, kh,
                               preferred_element_type=jnp.float32) * scale
                p = _softmax(s)
                oh = jnp.einsum('hqk,hkd->hqd', p.astype(jnp.bfloat16), vh,
                                preferred_element_type=jnp.float32)
                ob = jnp.swapaxes(oh, 0, 1).reshape(S, D)
            rows.append(ob)
        attn = rows[0] if TB == 1 else jnp.concatenate(rows, axis=0)     # (T, D)
        x = jnp.dot(attn.astype(jnp.bfloat16), wo[...],
                    preferred_element_type=jnp.float32) + bo[...]

        # ---- sub-expert routing: softmax((x @ Wr + br) / temperature)
        logits = (jnp.dot(x.astype(jnp.bfloat16), wr[...],
                          preferred_element_type=jnp.float32) + br[...]) / temp_ref[...]
        scores = _softmax(logits)                                         # (T, E)

        # ---- gate: LN -> Linear -> GELU -> Linear -> Sigmoid (same for all experts)
        g = _ln(x, g_ln_g[...], g_ln_b[...])
        g = _gelu(jnp.dot(g.astype(jnp.bfloat16), gw1[...],
                          preferred_element_type=jnp.float32) + gb1[...])
        g = jax.nn.sigmoid(jnp.dot(g.astype(jnp.bfloat16), gw2[...],
                                   preferred_element_type=jnp.float32) + gb2[...])

        x_sc[...] = x
        xbf_sc[...] = x.astype(jnp.bfloat16)
        g_sc[...] = g
        sc_sc[...] = scores
        acc_sc[...] = jnp.zeros_like(acc_sc)

    # ------------------------------------------------------------ expert e step
    # TODO(synk): ExpertLayer source not provided; Linear(D,4D)->GELU->Linear(4D,D) FFN assumed.
    xe = xbf_sc[...]                                                      # (T, D) bf16
    h = _gelu(jnp.dot(xe, ew1[...], preferred_element_type=jnp.float32) + eb1[...])
    eo = jnp.dot(h.astype(jnp.bfloat16), ew2[...],
                 preferred_element_type=jnp.float32) + eb2[...]           # (T, D) f32

    # Per-token routing weight for this expert via one-hot lane mask + reduce
    # (avoids a dynamic lane-dim slice on the tiny (T, E) scores tensor).
    scores = sc_sc[...]                                                   # (T, E)
    lane = lax.broadcasted_iota(jnp.int32, scores.shape, 1)
    w_e = jnp.sum(jnp.where(lane == e_idx, scores, 0.0),
                  axis=-1, keepdims=True)                                 # (T, 1)
    acc_sc[...] = acc_sc[...] + w_e * eo

    # ------------------------------------------------------------- e == E - 1
    @pl.when(e_idx == n_exp - 1)
    def _finalize():
        # gate multiply hoisted out of the expert loop; dropout identity (eval)
        out = g_sc[...] * acc_sc[...]
        y = _ln(out + x_sc[...], f_ln_g[...], f_ln_b[...])
        o_ref[...] = y.reshape(TB, S, D)


def specialized_expert_forward(x, params, *, num_heads, num_experts):
    B, S, D = x.shape

    # Batch elements per token tile: fold as many sequences as possible into a
    # <=256-row tile (feeds the 128/256-row MXU) while evenly dividing B.
    TB = 1
    for cand in range(B, 0, -1):
        if B % cand == 0 and cand * S <= 256:
            TB = cand
            break
    T = TB * S

    # --- assemble inputs (matmul weights cast to bf16 once, outside the kernel)
    vals, in_specs = [], []
    for name in _WEIGHT_ORDER:
        v = params["pe"][:S] if name == "pe" else params[name]
        if name in _BF16_NAMES:
            v = v.astype(jnp.bfloat16)
        vals.append(v)
        if name in _EXPERT_NAMES:
            # stream one expert's weights per grid step along the expert axis
            blk = (None,) + v.shape[1:]
            in_specs.append(pl.BlockSpec(blk, lambda t, e: (e, 0, 0)))
        else:
            nd = v.ndim
            in_specs.append(pl.BlockSpec(v.shape, lambda t, e, _nd=nd: (0,) * _nd))

    x_spec = pl.BlockSpec((TB, S, D), lambda t, e: (t, 0, 0))
    out_spec = pl.BlockSpec((TB, S, D), lambda t, e: (t, 0, 0))

    # --- advisory cost estimate for the XLA scheduler
    Ttot = B * S
    flops = (Ttot * D * D * (8 + 8 + 4 + 16 * num_experts)   # proj/attn-proj/gate/experts
             + 4 * B * S * S * D * max(1, num_heads) // max(1, num_heads)  # attn scores+mix
             + 2 * Ttot * D * num_experts)                    # router
    trans = Ttot * (2 * D + 2 * D + 4 * D * num_experts + num_experts + S)
    bytes_accessed = (int(x.size) * 4 + B * S * D * 4
                      + sum(int(v.size) * v.dtype.itemsize for v in vals))
    cost = pl.CostEstimate(flops=int(flops), transcendentals=int(trans),
                           bytes_accessed=int(bytes_accessed))

    kernel = functools.partial(_expert_net_kernel, num_heads)

    return pl.pallas_call(
        kernel,
        out_shape=jax.ShapeDtypeStruct((B, S, D), jnp.float32),
        grid_spec=pltpu.PrefetchScalarGridSpec(
            num_scalar_prefetch=0,
            grid=(B // TB, num_experts),          # (token tiles, experts)
            in_specs=[x_spec] + in_specs,
            out_specs=out_spec,
            scratch_shapes=[
                pltpu.VMEM((T, D), jnp.float32),            # post-attention x (f32)
                pltpu.VMEM((T, D), jnp.bfloat16),           # post-attention x (bf16)
                pltpu.VMEM((T, D), jnp.float32),            # gate values
                pltpu.VMEM((T, num_experts), jnp.float32),  # router scores
                pltpu.VMEM((T, D), jnp.float32),            # expert-sum accumulator
            ]),
        compiler_params=pltpu.CompilerParams(
            dimension_semantics=("parallel", "arbitrary"),
            vmem_limit_bytes=48 * 1024 * 1024,   # safe on v5e/v6e (128 MiB) and v7x (64 MiB)
        ),
        cost_estimate=cost,
    )(x, *vals)


def init_params(key, d_model, num_sub_experts, max_seq_len):
    D, E = d_model, num_sub_experts
    ks = iter(jax.random.split(key, 32))

    def xavier(shape):
        fan_in, fan_out = shape[-2], shape[-1]
        lim = math.sqrt(6.0 / (fan_in + fan_out))
        return jax.random.uniform(next(ks), shape, jnp.float32, -lim, lim)

    p = {}
    # input_proj
    p["ip_ln_g"] = jnp.ones((1, D), jnp.float32)
    p["ip_ln_b"] = jnp.zeros((1, D), jnp.float32)
    p["ip_w1"] = xavier((D, 2 * D)); p["ip_b1"] = jnp.zeros((1, 2 * D), jnp.float32)
    p["ip_w2"] = xavier((2 * D, D)); p["ip_b2"] = jnp.zeros((1, D), jnp.float32)
    # positional encoding (learned)
    p["pe"] = 0.02 * jax.random.normal(next(ks), (max_seq_len, D), jnp.float32)
    # domain attention
    for name in ("wq", "wk", "wv", "wo"):
        p[name] = xavier((D, D))
    for name in ("bq", "bk", "bv", "bo"):
        p[name] = jnp.zeros((1, D), jnp.float32)
    # sub router + temperature
    p["wr"] = xavier((D, E)); p["br"] = jnp.zeros((1, E), jnp.float32)
    p["temp"] = jnp.full((1, 1), 1.0 / math.sqrt(D), jnp.float32)
    # sub experts (stacked)
    p["ew1"] = xavier((E, D, 4 * D)); p["eb1"] = jnp.zeros((E, 1, 4 * D), jnp.float32)
    p["ew2"] = xavier((E, 4 * D, D)); p["eb2"] = jnp.zeros((E, 1, D), jnp.float32)
    # gate
    p["g_ln_g"] = jnp.ones((1, D), jnp.float32)
    p["g_ln_b"] = jnp.zeros((1, D), jnp.float32)
    p["gw1"] = xavier((D, D)); p["gb1"] = jnp.zeros((1, D), jnp.float32)
    p["gw2"] = xavier((D, D)); p["gb2"] = jnp.zeros((1, D), jnp.float32)
    # final layer norm
    p["f_ln_g"] = jnp.ones((1, D), jnp.float32)
    p["f_ln_b"] = jnp.zeros((1, D), jnp.float32)
    return p


if __name__ == "__main__":
    B, S, D = 2, 8, 32
    E = 4
    MAX_SEQ_LEN = 16
    NUM_HEADS = max(1, D // 64)   # matches the module: max(1, d_model // 64)

    key = jax.random.PRNGKey(0)
    k_x, k_p = jax.random.split(key)
    x = jax.random.normal(k_x, (B, S, D), jnp.float32)
    params = init_params(k_p, D, E, MAX_SEQ_LEN)

    out = specialized_expert_forward(x, params, num_heads=NUM_HEADS, num_experts=E)
    out = jax.block_until_ready(out)
    assert out.shape == (B, S, D) and out.dtype == jnp.float32
    assert bool(jnp.all(jnp.isfinite(out)))
    print("KERNEL_OK")
</pallas_src>

<mosaic_0001>
module attributes {stable_mosaic.version = 11 : i64} {
  func.func @_expert_net_kernel(%arg0: i32, %arg1: i32, %arg2: memref<2x8x32xf32, #tpu.memory_space<vmem>>, %arg3: memref<1x32xf32, #tpu.memory_space<vmem>>, %arg4: memref<1x32xf32, #tpu.memory_space<vmem>>, %arg5: memref<32x64xbf16, #tpu.memory_space<vmem>>, %arg6: memref<1x64xf32, #tpu.memory_space<vmem>>, %arg7: memref<64x32xbf16, #tpu.memory_space<vmem>>, %arg8: memref<1x32xf32, #tpu.memory_space<vmem>>, %arg9: memref<8x32xf32, #tpu.memory_space<vmem>>, %arg10: memref<32x32xbf16, #tpu.memory_space<vmem>>, %arg11: memref<1x32xf32, #tpu.memory_space<vmem>>, %arg12: memref<32x32xbf16, #tpu.memory_space<vmem>>, %arg13: memref<1x32xf32, #tpu.memory_space<vmem>>, %arg14: memref<32x32xbf16, #tpu.memory_space<vmem>>, %arg15: memref<1x32xf32, #tpu.memory_space<vmem>>, %arg16: memref<32x32xbf16, #tpu.memory_space<vmem>>, %arg17: memref<1x32xf32, #tpu.memory_space<vmem>>, %arg18: memref<32x4xbf16, #tpu.memory_space<vmem>>, %arg19: memref<1x4xf32, #tpu.memory_space<vmem>>, %arg20: memref<1x1xf32, #tpu.memory_space<vmem>>, %arg21: memref<1x32x128xbf16, #tpu.memory_space<vmem>>, %arg22: memref<1x1x128xf32, #tpu.memory_space<vmem>>, %arg23: memref<1x128x32xbf16, #tpu.memory_space<vmem>>, %arg24: memref<1x1x32xf32, #tpu.memory_space<vmem>>, %arg25: memref<1x32xf32, #tpu.memory_space<vmem>>, %arg26: memref<1x32xf32, #tpu.memory_space<vmem>>, %arg27: memref<32x32xbf16, #tpu.memory_space<vmem>>, %arg28: memref<1x32xf32, #tpu.memory_space<vmem>>, %arg29: memref<32x32xbf16, #tpu.memory_space<vmem>>, %arg30: memref<1x32xf32, #tpu.memory_space<vmem>>, %arg31: memref<1x32xf32, #tpu.memory_space<vmem>>, %arg32: memref<1x32xf32, #tpu.memory_space<vmem>>, %arg33: memref<2x8x32xf32, #tpu.memory_space<vmem>>, %arg34: memref<16x32xf32, #tpu.memory_space<vmem>>, %arg35: memref<16x32xbf16, #tpu.memory_space<vmem>>, %arg36: memref<16x32xf32, #tpu.memory_space<vmem>>, %arg37: memref<16x4xf32, #tpu.memory_space<vmem>>, %arg38: memref<16x32xf32, #tpu.memory_space<vmem>>) attributes {dimension_semantics = [#tpu.dimension_semantics<parallel>, #tpu.dimension_semantics<arbitrary>], iteration_bounds = array<i64: 1, 4>, scalar_prefetch = 0 : i64, scratch_operands = 5 : i64, tpu.core_type = #tpu.core_type<tc>, window_params = [{transform_indices = @transform_0, window_bounds = array<i64: 2, 8, 32>}, {pipeline_mode = #tpu.pipeline_mode<synchronous>, transform_indices = @transform_1, window_bounds = array<i64: 1, 32>}, {pipeline_mode = #tpu.pipeline_mode<synchronous>, transform_indices = @transform_2, window_bounds = array<i64: 1, 32>}, {pipeline_mode = #tpu.pipeline_mode<synchronous>, transform_indices = @transform_3, window_bounds = array<i64: 32, 64>}, {pipeline_mode = #tpu.pipeline_mode<synchronous>, transform_indices = @transform_4, window_bounds = array<i64: 1, 64>}, {pipeline_mode = #tpu.pipeline_mode<synchronous>, transform_indices = @transform_5, window_bounds = array<i64: 64, 32>}, {pipeline_mode = #tpu.pipeline_mode<synchronous>, transform_indices = @transform_6, window_bounds = array<i64: 1, 32>}, {pipeline_mode = #tpu.pipeline_mode<synchronous>, transform_indices = @transform_7, window_bounds = array<i64: 8, 32>}, {pipeline_mode = #tpu.pipeline_mode<synchronous>, transform_indices = @transform_8, window_bounds = array<i64: 32, 32>}, {pipeline_mode = #tpu.pipeline_mode<synchronous>, transform_indices = @transform_9, window_bounds = array<i64: 1, 32>}, {pipeline_mode = #tpu.pipeline_mode<synchronous>, transform_indices = @transform_10, window_bounds = array<i64: 32, 32>}, {pipeline_mode = #tpu.pipeline_mode<synchronous>, transform_indices = @transform_11, window_bounds = array<i64: 1, 32>}, {pipeline_mode = #tpu.pipeline_mode<synchronous>, transform_indices = @transform_12, window_bounds = array<i64: 32, 32>}, {pipeline_mode = #tpu.pipeline_mode<synchronous>, transform_indices = @transform_13, window_bounds = array<i64: 1, 32>}, {pipeline_mode = #tpu.pipeline_mode<synchronous>, transform_indices = @transform_14, window_bounds = array<i64: 32, 32>}, {pipeline_mode = #tpu.pipeline_mode<synchronous>, transform_indices = @transform_15, window_bounds = array<i64: 1, 32>}, {pipeline_mode = #tpu.pipeline_mode<synchronous>, transform_indices = @transform_16, window_bounds = array<i64: 32, 4>}, {pipeline_mode = #tpu.pipeline_mode<synchronous>, transform_indices = @transform_17, window_bounds = array<i64: 1, 4>}, {pipeline_mode = #tpu.pipeline_mode<synchronous>, transform_indices = @transform_18, window_bounds = array<i64: 1, 1>}, {transform_indices = @transform_19, window_bounds = array<i64: 1, 32, 128>}, {transform_indices = @transform_20, window_bounds = array<i64: 1, 1, 128>}, {transform_indices = @transform_21, window_bounds = array<i64: 1, 128, 32>}, {transform_indices = @transform_22, window_bounds = array<i64: 1, 1, 32>}, {pipeline_mode = #tpu.pipeline_mode<synchronous>, transform_indices = @transform_23, window_bounds = array<i64: 1, 32>}, {pipeline_mode = #tpu.pipeline_mode<synchronous>, transform_indices = @transform_24, window_bounds = array<i64: 1, 32>}, {pipeline_mode = #tpu.pipeline_mode<synchronous>, transform_indices = @transform_25, window_bounds = array<i64: 32, 32>}, {pipeline_mode = #tpu.pipeline_mode<synchronous>, transform_indices = @transform_26, window_bounds = array<i64: 1, 32>}, {pipeline_mode = #tpu.pipeline_mode<synchronous>, transform_indices = @transform_27, window_bounds = array<i64: 32, 32>}, {pipeline_mode = #tpu.pipeline_mode<synchronous>, transform_indices = @transform_28, window_bounds = array<i64: 1, 32>}, {pipeline_mode = #tpu.pipeline_mode<synchronous>, transform_indices = @transform_29, window_bounds = array<i64: 1, 32>}, {pipeline_mode = #tpu.pipeline_mode<synchronous>, transform_indices = @transform_30, window_bounds = array<i64: 1, 32>}, {transform_indices = @transform_31, window_bounds = array<i64: 2, 8, 32>}]} {
    %c0_i32 = arith.constant 0 : i32
    %0 = arith.cmpi eq, %arg1, %c0_i32 : i32
    %1 = arith.extui %0 : i1 to i32
    %c0_i32_0 = arith.constant 0 : i32
    %2 = arith.cmpi ne, %1, %c0_i32_0 : i32
    scf.if %2 {
      %c0_27 = arith.constant 0 : index
      %c0_28 = arith.constant 0 : index
      %c0_29 = arith.constant 0 : index
      %43 = vector.load %arg2[%c0_27, %c0_28, %c0_29] : memref<2x8x32xf32, #tpu.memory_space<vmem>>, vector<2x8x32xf32>
      %44 = vector.shape_cast %43 : vector<2x8x32xf32> to vector<16x32xf32>
      %c0_30 = arith.constant 0 : index
      %c0_31 = arith.constant 0 : index
      %45 = vector.load %arg3[%c0_30, %c0_31] : memref<1x32xf32, #tpu.memory_space<vmem>>, vector<1x32xf32>
      %c0_32 = arith.constant 0 : index
      %c0_33 = arith.constant 0 : index
      %46 = vector.load %arg4[%c0_32, %c0_33] : memref<1x32xf32, #tpu.memory_space<vmem>>, vector<1x32xf32>
      %cst_34 = arith.constant dense<0.000000e+00> : vector<16xf32>
      %47 = vector.multi_reduction <add>, %44, %cst_34 [1] : vector<16x32xf32> to vector<16xf32>
      %48 = vector.shape_cast %47 : vector<16xf32> to vector<16x1xf32>
      %cst_35 = arith.constant 3.200000e+01 : f32
      %49 = vector.broadcast %cst_35 : f32 to vector<16x1xf32>
      %50 = arith.divf %48, %49 : vector<16x1xf32>
      %51 = vector.broadcast %50 : vector<16x1xf32> to vector<16x32xf32>
      %52 = arith.subf %44, %51 : vector<16x32xf32>
      %53 = arith.mulf %52, %52 : vector<16x32xf32>
      %cst_36 = arith.constant dense<0.000000e+00> : vector<16xf32>
      %54 = vector.multi_reduction <add>, %53, %cst_36 [1] : vector<16x32xf32> to vector<16xf32>
      %55 = vector.shape_cast %54 : vector<16xf32> to vector<16x1xf32>
      %cst_37 = arith.constant 3.200000e+01 : f32
      %56 = vector.broadcast %cst_37 : f32 to vector<16x1xf32>
      %57 = arith.divf %55, %56 : vector<16x1xf32>
      %58 = vector.broadcast %50 : vector<16x1xf32> to vector<16x32xf32>
      %59 = arith.subf %44, %58 : vector<16x32xf32>
      %cst_38 = arith.constant 9.99999974E-6 : f32
      %60 = vector.broadcast %cst_38 : f32 to vector<16x1xf32>
      %61 = arith.addf %57, %60 : vector<16x1xf32>
      %62 = math.rsqrt %61 : vector<16x1xf32>
      %63 = vector.broadcast %62 : vector<16x1xf32> to vector<16x32xf32>
      %64 = arith.mulf %59, %63 : vector<16x32xf32>
      %65 = vector.broadcast %45 : vector<1x32xf32> to vector<16x32xf32>
      %66 = arith.mulf %64, %65 : vector<16x32xf32>
      %67 = vector.broadcast %46 : vector<1x32xf32> to vector<16x32xf32>
      %68 = arith.addf %66, %67 : vector<16x32xf32>
      %69 = arith.truncf %68 : vector<16x32xf32> to vector<16x32xbf16>
      %c0_39 = arith.constant 0 : index
      %c0_40 = arith.constant 0 : index
      %70 = vector.load %arg5[%c0_39, %c0_40] : memref<32x64xbf16, #tpu.memory_space<vmem>>, vector<32x64xbf16>
      %cst_41 = arith.constant dense<0.000000e+00> : vector<16x64xf32>
      %71 = tpu.matmul %69, %70, %cst_41 {dimension_numbers = #tpu.dot_dimension_numbers<[1], [0], [0], [1], [0, 0, 1, 1], [], []>} : vector<16x32xbf16>, vector<32x64xbf16>, vector<16x64xf32> -> vector<16x64xf32>
      %c0_42 = arith.constant 0 : index
      %c0_43 = arith.constant 0 : index
      %72 = vector.load %arg6[%c0_42, %c0_43] : memref<1x64xf32, #tpu.memory_space<vmem>>, vector<1x64xf32>
      %73 = vector.broadcast %72 : vector<1x64xf32> to vector<16x64xf32>
      %74 = arith.addf %71, %73 : vector<16x64xf32>
      %cst_44 = arith.constant 5.000000e-01 : f32
      %75 = vector.broadcast %cst_44 : f32 to vector<16x64xf32>
      %76 = arith.mulf %75, %74 : vector<16x64xf32>
      %cst_45 = arith.constant 0.707106769 : f32
      %77 = vector.broadcast %cst_45 : f32 to vector<16x64xf32>
      %78 = arith.mulf %74, %77 : vector<16x64xf32>
      %79 = math.erf %78 : vector<16x64xf32>
      %cst_46 = arith.constant 1.000000e+00 : f32
      %80 = vector.broadcast %cst_46 : f32 to vector<16x64xf32>
      %81 = arith.addf %80, %79 : vector<16x64xf32>
      %82 = arith.mulf %76, %81 : vector<16x64xf32>
      %83 = arith.truncf %82 : vector<16x64xf32> to vector<16x64xbf16>
      %c0_47 = arith.constant 0 : index
      %c0_48 = arith.constant 0 : index
      %84 = vector.load %arg7[%c0_47, %c0_48] : memref<64x32xbf16, #tpu.memory_space<vmem>>, vector<64x32xbf16>
      %cst_49 = arith.constant dense<0.000000e+00> : vector<16x32xf32>
      %85 = tpu.matmul %83, %84, %cst_49 {dimension_numbers = #tpu.dot_dimension_numbers<[1], [0], [0], [1], [0, 0, 1, 1], [], []>} : vector<16x64xbf16>, vector<64x32xbf16>, vector<16x32xf32> -> vector<16x32xf32>
      %c0_50 = arith.constant 0 : index
      %c0_51 = arith.constant 0 : index
      %86 = vector.load %arg8[%c0_50, %c0_51] : memref<1x32xf32, #tpu.memory_space<vmem>>, vector<1x32xf32>
      %87 = vector.broadcast %86 : vector<1x32xf32> to vector<16x32xf32>
      %88 = arith.addf %85, %87 : vector<16x32xf32>
      %89 = arith.addf %88, %44 : vector<16x32xf32>
      %90 = vector.shape_cast %89 : vector<16x32xf32> to vector<2x8x32xf32>
      %c0_52 = arith.constant 0 : index
      %c0_53 = arith.constant 0 : index
      %91 = vector.load %arg9[%c0_52, %c0_53] : memref<8x32xf32, #tpu.memory_space<vmem>>, vector<8x32xf32>
      %92 = vector.shape_cast %91 : vector<8x32xf32> to vector<1x8x32xf32>
      %93 = vector.broadcast %92 : vector<1x8x32xf32> to vector<2x8x32xf32>
      %94 = arith.addf %90, %93 : vector<2x8x32xf32>
      %95 = vector.shape_cast %94 : vector<2x8x32xf32> to vector<16x32xf32>
      %96 = arith.truncf %95 : vector<16x32xf32> to vector<16x32xbf16>
      %c0_54 = arith.constant 0 : index
      %c0_55 = arith.constant 0 : index
      %97 = vector.load %arg10[%c0_54, %c0_55] : memref<32x32xbf16, #tpu.memory_space<vmem>>, vector<32x32xbf16>
      %cst_56 = arith.constant dense<0.000000e+00> : vector<16x32xf32>
      %98 = tpu.matmul %96, %97, %cst_56 {dimension_numbers = #tpu.dot_dimension_numbers<[1], [0], [0], [1], [0, 0, 1, 1], [], []>} : vector<16x32xbf16>, vector<32x32xbf16>, vector<16x32xf32> -> vector<16x32xf32>
      %c0_57 = arith.constant 0 : index
      %c0_58 = arith.constant 0 : index
      %99 = vector.load %arg11[%c0_57, %c0_58] : memref<1x32xf32, #tpu.memory_space<vmem>>, vector<1x32xf32>
      %100 = vector.broadcast %99 : vector<1x32xf32> to vector<16x32xf32>
      %101 = arith.addf %98, %100 : vector<16x32xf32>
      %102 = arith.truncf %101 : vector<16x32xf32> to vector<16x32xbf16>
      %c0_59 = arith.constant 0 : index
      %c0_60 = arith.constant 0 : index
      %103 = vector.load %arg12[%c0_59, %c0_60] : memref<32x32xbf16, #tpu.memory_space<vmem>>, vector<32x32xbf16>
      %cst_61 = arith.constant dense<0.000000e+00> : vector<16x32xf32>
      %104 = tpu.matmul %96, %103, %cst_61 {dimension_numbers = #tpu.dot_dimension_numbers<[1], [0], [0], [1], [0, 0, 1, 1], [], []>} : vector<16x32xbf16>, vector<32x32xbf16>, vector<16x32xf32> -> vector<16x32xf32>
      %c0_62 = arith.constant 0 : index
      %c0_63 = arith.constant 0 : index
      %105 = vector.load %arg13[%c0_62, %c0_63] : memref<1x32xf32, #tpu.memory_space<vmem>>, vector<1x32xf32>
      %106 = vector.broadcast %105 : vector<1x32xf32> to vector<16x32xf32>
      %107 = arith.addf %104, %106 : vector<16x32xf32>
      %108 = arith.truncf %107 : vector<16x32xf32> to vector<16x32xbf16>
      %c0_64 = arith.constant 0 : index
      %c0_65 = arith.constant 0 : index
      %109 = vector.load %arg14[%c0_64, %c0_65] : memref<32x32xbf16, #tpu.memory_space<vmem>>, vector<32x32xbf16>
      %cst_66 = arith.constant dense<0.000000e+00> : vector<16x32xf32>
      %110 = tpu.matmul %96, %109, %cst_66 {dimension_numbers = #tpu.dot_dimension_numbers<[1], [0], [0], [1], [0, 0, 1, 1], [], []>} : vector<16x32xbf16>, vector<32x32xbf16>, vector<16x32xf32> -> vector<16x32xf32>
      %c0_67 = arith.constant 0 : index
      %c0_68 = arith.constant 0 : index
      %111 = vector.load %arg15[%c0_67, %c0_68] : memref<1x32xf32, #tpu.memory_space<vmem>>, vector<1x32xf32>
      %112 = vector.broadcast %111 : vector<1x32xf32> to vector<16x32xf32>
      %113 = arith.addf %110, %112 : vector<16x32xf32>
      %114 = arith.truncf %113 : vector<16x32xf32> to vector<16x32xbf16>
      %115 = vector.extract_strided_slice %102 {offsets = [0, 0], sizes = [8, 32], strides = [1, 1]} : vector<16x32xbf16> to vector<8x32xbf16>
      %116 = vector.extract_strided_slice %108 {offsets = [0, 0], sizes = [8, 32], strides = [1, 1]} : vector<16x32xbf16> to vector<8x32xbf16>
      %117 = vector.extract_strided_slice %114 {offsets = [0, 0], sizes = [8, 32], strides = [1, 1]} : vector<16x32xbf16> to vector<8x32xbf16>
      "tpu.trace_start"() <{level = 10 : i32, message = "qd,kd->qk"}> : () -> ()
      %cst_69 = arith.constant dense<0.000000e+00> : vector<8x8xf32>
      %118 = tpu.matmul %115, %116, %cst_69 {dimension_numbers = #tpu.dot_dimension_numbers<[1], [1], [0], [0], [0, 0, 1, 0], [], []>} : vector<8x32xbf16>, vector<8x32xbf16>, vector<8x8xf32> -> vector<8x8xf32>
      "tpu.trace_stop"() : () -> ()
      %cst_70 = arith.constant 0.176776692 : f32
      %119 = vector.broadcast %cst_70 : f32 to vector<8x8xf32>
      %120 = arith.mulf %118, %119 : vector<8x8xf32>
      %cst_71 = arith.constant dense<0xFF800000> : vector<8xf32>
      %121 = vector.multi_reduction <maximumf>, %120, %cst_71 [1] : vector<8x8xf32> to vector<8xf32>
      %122 = vector.shape_cast %121 : vector<8xf32> to vector<8x1xf32>
      %123 = vector.broadcast %122 : vector<8x1xf32> to vector<8x8xf32>
      %124 = arith.subf %120, %123 : vector<8x8xf32>
      %125 = math.exp %124 : vector<8x8xf32>
      %cst_72 = arith.constant dense<0.000000e+00> : vector<8xf32>
      %126 = vector.multi_reduction <add>, %125, %cst_72 [1] : vector<8x8xf32> to vector<8xf32>
      %127 = vector.shape_cast %126 : vector<8xf32> to vector<8x1xf32>
      %128 = tpu.reciprocal %127 {approx = true} : vector<8x1xf32> -> vector<8x1xf32>
      %129 = vector.broadcast %128 : vector<8x1xf32> to vector<8x8xf32>
      %130 = arith.mulf %125, %129 : vector<8x8xf32>
      %131 = arith.truncf %130 : vector<8x8xf32> to vector<8x8xbf16>
      %cst_73 = arith.constant dense<0.000000e+00> : vector<8x32xf32>
      %132 = tpu.matmul %131, %117, %cst_73 {dimension_numbers = #tpu.dot_dimension_numbers<[1], [0], [0], [1], [0, 0, 1, 1], [], []>} : vector<8x8xbf16>, vector<8x32xbf16>, vector<8x32xf32> -> vector<8x32xf32>
      %133 = vector.extract_strided_slice %102 {offsets = [8, 0], sizes = [8, 32], strides = [1, 1]} : vector<16x32xbf16> to vector<8x32xbf16>
      %134 = vector.extract_strided_slice %108 {offsets = [8, 0], sizes = [8, 32], strides = [1, 1]} : vector<16x32xbf16> to vector<8x32xbf16>
      %135 = vector.extract_strided_slice %114 {offsets = [8, 0], sizes = [8, 32], strides = [1, 1]} : vector<16x32xbf16> to vector<8x32xbf16>
      "tpu.trace_start"() <{level = 10 : i32, message = "qd,kd->qk"}> : () -> ()
      %cst_74 = arith.constant dense<0.000000e+00> : vector<8x8xf32>
      %136 = tpu.matmul %133, %134, %cst_74 {dimension_numbers = #tpu.dot_dimension_numbers<[1], [1], [0], [0], [0, 0, 1, 0], [], []>} : vector<8x32xbf16>, vector<8x32xbf16>, vector<8x8xf32> -> vector<8x8xf32>
      "tpu.trace_stop"() : () -> ()
      %cst_75 = arith.constant 0.176776692 : f32
      %137 = vector.broadcast %cst_75 : f32 to vector<8x8xf32>
      %138 = arith.mulf %136, %137 : vector<8x8xf32>
      %cst_76 = arith.constant dense<0xFF800000> : vector<8xf32>
      %139 = vector.multi_reduction <maximumf>, %138, %cst_76 [1] : vector<8x8xf32> to vector<8xf32>
      %140 = vector.shape_cast %139 : vector<8xf32> to vector<8x1xf32>
      %141 = vector.broadcast %140 : vector<8x1xf32> to vector<8x8xf32>
      %142 = arith.subf %138, %141 : vector<8x8xf32>
      %143 = math.exp %142 : vector<8x8xf32>
      %cst_77 = arith.constant dense<0.000000e+00> : vector<8xf32>
      %144 = vector.multi_reduction <add>, %143, %cst_77 [1] : vector<8x8xf32> to vector<8xf32>
      %145 = vector.shape_cast %144 : vector<8xf32> to vector<8x1xf32>
      %146 = tpu.reciprocal %145 {approx = true} : vector<8x1xf32> -> vector<8x1xf32>
      %147 = vector.broadcast %146 : vector<8x1xf32> to vector<8x8xf32>
      %148 = arith.mulf %143, %147 : vector<8x8xf32>
      %149 = arith.truncf %148 : vector<8x8xf32> to vector<8x8xbf16>
      %cst_78 = arith.constant dense<0.000000e+00> : vector<8x32xf32>
      %150 = tpu.matmul %149, %135, %cst_78 {dimension_numbers = #tpu.dot_dimension_numbers<[1], [0], [0], [1], [0, 0, 1, 1], [], []>} : vector<8x8xbf16>, vector<8x32xbf16>, vector<8x32xf32> -> vector<8x32xf32>
      %151 = tpu.concatenate %132, %150 in 0 : vector<8x32xf32>, vector<8x32xf32> -> vector<16x32xf32>
      %152 = arith.truncf %151 : vector<16x32xf32> to vector<16x32xbf16>
      %c0_79 = arith.constant 0 : index
      %c0_80 = arith.constant 0 : index
      %153 = vector.load %arg16[%c0_79, %c0_80] : memref<32x32xbf16, #tpu.memory_space<vmem>>, vector<32x32xbf16>
      %cst_81 = arith.constant dense<0.000000e+00> : vector<16x32xf32>
      %154 = tpu.matmul %152, %153, %cst_81 {dimension_numbers = #tpu.dot_dimension_numbers<[1], [0], [0], [1], [0, 0, 1, 1], [], []>} : vector<16x32xbf16>, vector<32x32xbf16>, vector<16x32xf32> -> vector<16x32xf32>
      %c0_82 = arith.constant 0 : index
      %c0_83 = arith.constant 0 : index
      %155 = vector.load %arg17[%c0_82, %c0_83] : memref<1x32xf32, #tpu.memory_space<vmem>>, vector<1x32xf32>
      %156 = vector.broadcast %155 : vector<1x32xf32> to vector<16x32xf32>
      %157 = arith.addf %154, %156 : vector<16x32xf32>
      %158 = arith.truncf %157 : vector<16x32xf32> to vector<16x32xbf16>
      %c0_84 = arith.constant 0 : index
      %c0_85 = arith.constant 0 : index
      %159 = vector.load %arg18[%c0_84, %c0_85] : memref<32x4xbf16, #tpu.memory_space<vmem>>, vector<32x4xbf16>
      %cst_86 = arith.constant dense<0.000000e+00> : vector<16x4xf32>
      %160 = tpu.matmul %158, %159, %cst_86 {dimension_numbers = #tpu.dot_dimension_numbers<[1], [0], [0], [1], [0, 0, 1, 1], [], []>} : vector<16x32xbf16>, vector<32x4xbf16>, vector<16x4xf32> -> vector<16x4xf32>
      %c0_87 = arith.constant 0 : index
      %c0_88 = arith.constant 0 : index
      %161 = vector.load %arg19[%c0_87, %c0_88] : memref<1x4xf32, #tpu.memory_space<vmem>>, vector<1x4xf32>
      %162 = vector.broadcast %161 : vector<1x4xf32> to vector<16x4xf32>
      %163 = arith.addf %160, %162 : vector<16x4xf32>
      %c0_89 = arith.constant 0 : index
      %c0_90 = arith.constant 0 : index
      %164 = vector.load %arg20[%c0_89, %c0_90] : memref<1x1xf32, #tpu.memory_space<vmem>>, vector<1x1xf32>
      %165 = vector.broadcast %164 : vector<1x1xf32> to vector<16x4xf32>
      %166 = arith.divf %163, %165 : vector<16x4xf32>
      %cst_91 = arith.constant dense<0xFF800000> : vector<16xf32>
      %167 = vector.multi_reduction <maximumf>, %166, %cst_91 [1] : vector<16x4xf32> to vector<16xf32>
      %168 = vector.shape_cast %167 : vector<16xf32> to vector<16x1xf32>
      %169 = vector.broadcast %168 : vector<16x1xf32> to vector<16x4xf32>
      %170 = arith.subf %166, %169 : vector<16x4xf32>
      %171 = math.exp %170 : vector<16x4xf32>
      %cst_92 = arith.constant dense<0.000000e+00> : vector<16xf32>
      %172 = vector.multi_reduction <add>, %171, %cst_92 [1] : vector<16x4xf32> to vector<16xf32>
      %173 = vector.shape_cast %172 : vector<16xf32> to vector<16x1xf32>
      %174 = tpu.reciprocal %173 {approx = true} : vector<16x1xf32> -> vector<16x1xf32>
      %175 = vector.broadcast %174 : vector<16x1xf32> to vector<16x4xf32>
      %176 = arith.mulf %171, %175 : vector<16x4xf32>
      %c0_93 = arith.constant 0 : index
      %c0_94 = arith.constant 0 : index
      %177 = vector.load %arg25[%c0_93, %c0_94] : memref<1x32xf32, #tpu.memory_space<vmem>>, vector<1x32xf32>
      %c0_95 = arith.constant 0 : index
      %c0_96 = arith.constant 0 : index
      %178 = vector.load %arg26[%c0_95, %c0_96] : memref<1x32xf32, #tpu.memory_space<vmem>>, vector<1x32xf32>
      %cst_97 = arith.constant dense<0.000000e+00> : vector<16xf32>
      %179 = vector.multi_reduction <add>, %157, %cst_97 [1] : vector<16x32xf32> to vector<16xf32>
      %180 = vector.shape_cast %179 : vector<16xf32> to vector<16x1xf32>
      %cst_98 = arith.constant 3.200000e+01 : f32
      %181 = vector.broadcast %cst_98 : f32 to vector<16x1xf32>
      %182 = arith.divf %180, %181 : vector<16x1xf32>
      %183 = vector.broadcast %182 : vector<16x1xf32> to vector<16x32xf32>
      %184 = arith.subf %157, %183 : vector<16x32xf32>
      %185 = arith.mulf %184, %184 : vector<16x32xf32>
      %cst_99 = arith.constant dense<0.000000e+00> : vector<16xf32>
      %186 = vector.multi_reduction <add>, %185, %cst_99 [1] : vector<16x32xf32> to vector<16xf32>
      %187 = vector.shape_cast %186 : vector<16xf32> to vector<16x1xf32>
      %cst_100 = arith.constant 3.200000e+01 : f32
      %188 = vector.broadcast %cst_100 : f32 to vector<16x1xf32>
      %189 = arith.divf %187, %188 : vector<16x1xf32>
      %190 = vector.broadcast %182 : vector<16x1xf32> to vector<16x32xf32>
      %191 = arith.subf %157, %190 : vector<16x32xf32>
      %cst_101 = arith.constant 9.99999974E-6 : f32
      %192 = vector.broadcast %cst_101 : f32 to vector<16x1xf32>
      %193 = arith.addf %189, %192 : vector<16x1xf32>
      %194 = math.rsqrt %193 : vector<16x1xf32>
      %195 = vector.broadcast %194 : vector<16x1xf32> to vector<16x32xf32>
      %196 = arith.mulf %191, %195 : vector<16x32xf32>
      %197 = vector.broadcast %177 : vector<1x32xf32> to vector<16x32xf32>
      %198 = arith.mulf %196, %197 : vector<16x32xf32>
      %199 = vector.broadcast %178 : vector<1x32xf32> to vector<16x32xf32>
      %200 = arith.addf %198, %199 : vector<16x32xf32>
      %201 = arith.truncf %200 : vector<16x32xf32> to vector<16x32xbf16>
      %c0_102 = arith.constant 0 : index
      %c0_103 = arith.constant 0 : index
      %202 = vector.load %arg27[%c0_102, %c0_103] : memref<32x32xbf16, #tpu.memory_space<vmem>>, vector<32x32xbf16>
      %cst_104 = arith.constant dense<0.000000e+00> : vector<16x32xf32>
      %203 = tpu.matmul %201, %202, %cst_104 {dimension_numbers = #tpu.dot_dimension_numbers<[1], [0], [0], [1], [0, 0, 1, 1], [], []>} : vector<16x32xbf16>, vector<32x32xbf16>, vector<16x32xf32> -> vector<16x32xf32>
      %c0_105 = arith.constant 0 : index
      %c0_106 = arith.constant 0 : index
      %204 = vector.load %arg28[%c0_105, %c0_106] : memref<1x32xf32, #tpu.memory_space<vmem>>, vector<1x32xf32>
      %205 = vector.broadcast %204 : vector<1x32xf32> to vector<16x32xf32>
      %206 = arith.addf %203, %205 : vector<16x32xf32>
      %cst_107 = arith.constant 5.000000e-01 : f32
      %207 = vector.broadcast %cst_107 : f32 to vector<16x32xf32>
      %208 = arith.mulf %207, %206 : vector<16x32xf32>
      %cst_108 = arith.constant 0.707106769 : f32
      %209 = vector.broadcast %cst_108 : f32 to vector<16x32xf32>
      %210 = arith.mulf %206, %209 : vector<16x32xf32>
      %211 = math.erf %210 : vector<16x32xf32>
      %cst_109 = arith.constant 1.000000e+00 : f32
      %212 = vector.broadcast %cst_109 : f32 to vector<16x32xf32>
      %213 = arith.addf %212, %211 : vector<16x32xf32>
      %214 = arith.mulf %208, %213 : vector<16x32xf32>
      %215 = arith.truncf %214 : vector<16x32xf32> to vector<16x32xbf16>
      %c0_110 = arith.constant 0 : index
      %c0_111 = arith.constant 0 : index
      %216 = vector.load %arg29[%c0_110, %c0_111] : memref<32x32xbf16, #tpu.memory_space<vmem>>, vector<32x32xbf16>
      %cst_112 = arith.constant dense<0.000000e+00> : vector<16x32xf32>
      %217 = tpu.matmul %215, %216, %cst_112 {dimension_numbers = #tpu.dot_dimension_numbers<[1], [0], [0], [1], [0, 0, 1, 1], [], []>} : vector<16x32xbf16>, vector<32x32xbf16>, vector<16x32xf32> -> vector<16x32xf32>
      %c0_113 = arith.constant 0 : index
      %c0_114 = arith.constant 0 : index
      %218 = vector.load %arg30[%c0_113, %c0_114] : memref<1x32xf32, #tpu.memory_space<vmem>>, vector<1x32xf32>
      %219 = vector.broadcast %218 : vector<1x32xf32> to vector<16x32xf32>
      %220 = arith.addf %217, %219 : vector<16x32xf32>
      %221 = arith.negf %220 : vector<16x32xf32>
      %222 = math.exp %221 : vector<16x32xf32>
      %cst_115 = arith.constant 1.000000e+00 : f32
      %223 = vector.broadcast %cst_115 : f32 to vector<16x32xf32>
      %224 = arith.addf %223, %222 : vector<16x32xf32>
      %225 = arith.divf %223, %224 : vector<16x32xf32>
      %c0_116 = arith.constant 0 : index
      %c0_117 = arith.constant 0 : index
      %226 = vector.load %arg34[%c0_116, %c0_117] : memref<16x32xf32, #tpu.memory_space<vmem>>, vector<16x32xf32>
      tpu.vector_store %arg34[%c0_116, %c0_117], %157 {strides = array<i32>} : memref<16x32xf32, #tpu.memory_space<vmem>>, vector<16x32xf32>,
      %227 = arith.truncf %157 : vector<16x32xf32> to vector<16x32xbf16>
      %c0_118 = arith.constant 0 : index
      %c0_119 = arith.constant 0 : index
      %228 = vector.load %arg35[%c0_118, %c0_119] : memref<16x32xbf16, #tpu.memory_space<vmem>>, vector<16x32xbf16>
      tpu.vector_store %arg35[%c0_118, %c0_119], %227 {strides = array<i32>} : memref<16x32xbf16, #tpu.memory_space<vmem>>, vector<16x32xbf16>,
      %c0_120 = arith.constant 0 : index
      %c0_121 = arith.constant 0 : index
      %229 = vector.load %arg36[%c0_120, %c0_121] : memref<16x32xf32, #tpu.memory_space<vmem>>, vector<16x32xf32>
      tpu.vector_store %arg36[%c0_120, %c0_121], %225 {strides = array<i32>} : memref<16x32xf32, #tpu.memory_space<vmem>>, vector<16x32xf32>,
      %c0_122 = arith.constant 0 : index
      %c0_123 = arith.constant 0 : index
      %230 = vector.load %arg37[%c0_122, %c0_123] : memref<16x4xf32, #tpu.memory_space<vmem>>, vector<16x4xf32>
      tpu.vector_store %arg37[%c0_122, %c0_123], %176 {strides = array<i32>} : memref<16x4xf32, #tpu.memory_space<vmem>>, vector<16x4xf32>,
      %cst_124 = arith.constant 0.000000e+00 : f32
      %231 = vector.broadcast %cst_124 : f32 to vector<16x32xf32>
      %c0_125 = arith.constant 0 : index
      %c0_126 = arith.constant 0 : index
      %232 = vector.load %arg38[%c0_125, %c0_126] : memref<16x32xf32, #tpu.memory_space<vmem>>, vector<16x32xf32>
      tpu.vector_store %arg38[%c0_125, %c0_126], %231 {strides = array<i32>} : memref<16x32xf32, #tpu.memory_space<vmem>>, vector<16x32xf32>,
    } else {
    }
    %c0 = arith.constant 0 : index
    %c0_1 = arith.constant 0 : index
    %3 = vector.load %arg35[%c0, %c0_1] : memref<16x32xbf16, #tpu.memory_space<vmem>>, vector<16x32xbf16>
    %c0_2 = arith.constant 0 : index
    %c0_3 = arith.constant 0 : index
    %c0_4 = arith.constant 0 : index
    %4 = vector.load %arg21[%c0_2, %c0_3, %c0_4] : memref<1x32x128xbf16, #tpu.memory_space<vmem>>, vector<1x32x128xbf16>
    %5 = vector.shape_cast %4 : vector<1x32x128xbf16> to vector<32x128xbf16>
    %cst = arith.constant dense<0.000000e+00> : vector<16x128xf32>
    %6 = tpu.matmul %3, %5, %cst {dimension_numbers = #tpu.dot_dimension_numbers<[1], [0], [0], [1], [0, 0, 1, 1], [], []>} : vector<16x32xbf16>, vector<32x128xbf16>, vector<16x128xf32> -> vector<16x128xf32>
    %c0_5 = arith.constant 0 : index
    %c0_6 = arith.constant 0 : index
    %c0_7 = arith.constant 0 : index
    %7 = vector.load %arg22[%c0_5, %c0_6, %c0_7] : memref<1x1x128xf32, #tpu.memory_space<vmem>>, vector<1x1x128xf32>
    %8 = vector.shape_cast %7 : vector<1x1x128xf32> to vector<1x128xf32>
    %9 = vector.broadcast %8 : vector<1x128xf32> to vector<16x128xf32>
    %10 = arith.addf %6, %9 : vector<16x128xf32>
    %cst_8 = arith.constant 5.000000e-01 : f32
    %11 = vector.broadcast %cst_8 : f32 to vector<16x128xf32>
    %12 = arith.mulf %11, %10 : vector<16x128xf32>
    %cst_9 = arith.constant 0.707106769 : f32
    %13 = vector.broadcast %cst_9 : f32 to vector<16x128xf32>
    %14 = arith.mulf %10, %13 : vector<16x128xf32>
    %15 = math.erf %14 : vector<16x128xf32>
    %cst_10 = arith.constant 1.000000e+00 : f32
    %16 = vector.broadcast %cst_10 : f32 to vector<16x128xf32>
    %17 = arith.addf %16, %15 : vector<16x128xf32>
    %18 = arith.mulf %12, %17 : vector<16x128xf32>
    %19 = arith.truncf %18 : vector<16x128xf32> to vector<16x128xbf16>
    %c0_11 = arith.constant 0 : index
    %c0_12 = arith.constant 0 : index
    %c0_13 = arith.constant 0 : index
    %20 = vector.load %arg23[%c0_11, %c0_12, %c0_13] : memref<1x128x32xbf16, #tpu.memory_space<vmem>>, vector<1x128x32xbf16>
    %21 = vector.shape_cast %20 : vector<1x128x32xbf16> to vector<128x32xbf16>
    %cst_14 = arith.constant dense<0.000000e+00> : vector<16x32xf32>
    %22 = tpu.matmul %19, %21, %cst_14 {dimension_numbers = #tpu.dot_dimension_numbers<[1], [0], [0], [1], [0, 0, 1, 1], [], []>} : vector<16x128xbf16>, vector<128x32xbf16>, vector<16x32xf32> -> vector<16x32xf32>
    %c0_15 = arith.constant 0 : index
    %c0_16 = arith.constant 0 : index
    %c0_17 = arith.constant 0 : index
    %23 = vector.load %arg24[%c0_15, %c0_16, %c0_17] : memref<1x1x32xf32, #tpu.memory_space<vmem>>, vector<1x1x32xf32>
    %24 = vector.shape_cast %23 : vector<1x1x32xf32> to vector<1x32xf32>
    %25 = vector.broadcast %24 : vector<1x32xf32> to vector<16x32xf32>
    %26 = arith.addf %22, %25 : vector<16x32xf32>
    %c0_18 = arith.constant 0 : index
    %c0_19 = arith.constant 0 : index
    %27 = vector.load %arg37[%c0_18, %c0_19] : memref<16x4xf32, #tpu.memory_space<vmem>>, vector<16x4xf32>
    %28 = tpu.iota {dimensions = array<i32: 1>} : vector<16x4xi32>
    %29 = vector.broadcast %arg1 : i32 to vector<16x4xi32>
    %30 = arith.cmpi eq, %28, %29 : vector<16x4xi32>
    %cst_20 = arith.constant 0.000000e+00 : f32
    %31 = vector.broadcast %cst_20 : f32 to vector<16x4xf32>
    %32 = arith.select %30, %27, %31 : vector<16x4xi1>, vector<16x4xf32>
    %cst_21 = arith.constant dense<0.000000e+00> : vector<16xf32>
    %33 = vector.multi_reduction <add>, %32, %cst_21 [1] : vector<16x4xf32> to vector<16xf32>
    %34 = vector.shape_cast %33 : vector<16xf32> to vector<16x1xf32>
    %c0_22 = arith.constant 0 : index
    %c0_23 = arith.constant 0 : index
    %35 = vector.load %arg38[%c0_22, %c0_23] : memref<16x32xf32, #tpu.memory_space<vmem>>, vector<16x32xf32>
    %36 = vector.broadcast %34 : vector<16x1xf32> to vector<16x32xf32>
    %37 = arith.mulf %36, %26 : vector<16x32xf32>
    %38 = arith.addf %35, %37 : vector<16x32xf32>
    %c0_24 = arith.constant 0 : index
    %c0_25 = arith.constant 0 : index
    %39 = vector.load %arg38[%c0_24, %c0_25] : memref<16x32xf32, #tpu.memory_space<vmem>>, vector<16x32xf32>
    tpu.vector_store %arg38[%c0_24, %c0_25], %38 {strides = array<i32>} : memref<16x32xf32, #tpu.memory_space<vmem>>, vector<16x32xf32>,
    %c3_i32 = arith.constant 3 : i32
    %40 = arith.cmpi eq, %arg1, %c3_i32 : i32
    %41 = arith.extui %40 : i1 to i32
    %c0_i32_26 = arith.constant 0 : i32
    %42 = arith.cmpi ne, %41, %c0_i32_26 : i32
    scf.if %42 {
      %c0_27 = arith.constant 0 : index
      %c0_28 = arith.constant 0 : index
      %43 = vector.load %arg36[%c0_27, %c0_28] : memref<16x32xf32, #tpu.memory_space<vmem>>, vector<16x32xf32>
      %c0_29 = arith.constant 0 : index
      %c0_30 = arith.constant 0 : index
      %44 = vector.load %arg38[%c0_29, %c0_30] : memref<16x32xf32, #tpu.memory_space<vmem>>, vector<16x32xf32>
      %45 = arith.mulf %43, %44 : vector<16x32xf32>
      %c0_31 = arith.constant 0 : index
      %c0_32 = arith.constant 0 : index
      %46 = vector.load %arg34[%c0_31, %c0_32] : memref<16x32xf32, #tpu.memory_space<vmem>>, vector<16x32xf32>
      %47 = arith.addf %45, %46 : vector<16x32xf32>
      %c0_33 = arith.constant 0 : index
      %c0_34 = arith.constant 0 : index
      %48 = vector.load %arg31[%c0_33, %c0_34] : memref<1x32xf32, #tpu.memory_space<vmem>>, vector<1x32xf32>
      %c0_35 = arith.constant 0 : index
      %c0_36 = arith.constant 0 : index
      %49 = vector.load %arg32[%c0_35, %c0_36] : memref<1x32xf32, #tpu.memory_space<vmem>>, vector<1x32xf32>
      %cst_37 = arith.constant dense<0.000000e+00> : vector<16xf32>
      %50 = vector.multi_reduction <add>, %47, %cst_37 [1] : vector<16x32xf32> to vector<16xf32>
      %51 = vector.shape_cast %50 : vector<16xf32> to vector<16x1xf32>
      %cst_38 = arith.constant 3.200000e+01 : f32
      %52 = vector.broadcast %cst_38 : f32 to vector<16x1xf32>
      %53 = arith.divf %51, %52 : vector<16x1xf32>
      %54 = vector.broadcast %53 : vector<16x1xf32> to vector<16x32xf32>
      %55 = arith.subf %47, %54 : vector<16x32xf32>
      %56 = arith.mulf %55, %55 : vector<16x32xf32>
      %cst_39 = arith.constant dense<0.000000e+00> : vector<16xf32>
      %57 = vector.multi_reduction <add>, %56, %cst_39 [1] : vector<16x32xf32> to vector<16xf32>
      %58 = vector.shape_cast %57 : vector<16xf32> to vector<16x1xf32>
      %cst_40 = arith.constant 3.200000e+01 : f32
      %59 = vector.broadcast %cst_40 : f32 to vector<16x1xf32>
      %60 = arith.divf %58, %59 : vector<16x1xf32>
      %61 = vector.broadcast %53 : vector<16x1xf32> to vector<16x32xf32>
      %62 = arith.subf %47, %61 : vector<16x32xf32>
      %cst_41 = arith.constant 9.99999974E-6 : f32
      %63 = vector.broadcast %cst_41 : f32 to vector<16x1xf32>
      %64 = arith.addf %60, %63 : vector<16x1xf32>
      %65 = math.rsqrt %64 : vector<16x1xf32>
      %66 = vector.broadcast %65 : vector<16x1xf32> to vector<16x32xf32>
      %67 = arith.mulf %62, %66 : vector<16x32xf32>
      %68 = vector.broadcast %48 : vector<1x32xf32> to vector<16x32xf32>
      %69 = arith.mulf %67, %68 : vector<16x32xf32>
      %70 = vector.broadcast %49 : vector<1x32xf32> to vector<16x32xf32>
      %71 = arith.addf %69, %70 : vector<16x32xf32>
      %72 = vector.shape_cast %71 : vector<16x32xf32> to vector<2x8x32xf32>
      %c0_42 = arith.constant 0 : index
      %c0_43 = arith.constant 0 : index
      %c0_44 = arith.constant 0 : index
      %73 = vector.load %arg33[%c0_42, %c0_43, %c0_44] : memref<2x8x32xf32, #tpu.memory_space<vmem>>, vector<2x8x32xf32>
      tpu.vector_store %arg33[%c0_42, %c0_43, %c0_44], %72 {strides = array<i32>} : memref<2x8x32xf32, #tpu.memory_space<vmem>>, vector<2x8x32xf32>,
    } else {
    }
    return
  }
  func.func @transform_0(%arg0: i32, %arg1: i32) -> (i32, i32, i32) {
    %c0_i32 = arith.constant 0 : i32
    %c0_i32_0 = arith.constant 0 : i32
    %c0_i32_1 = arith.constant 0 : i32
    return %arg0, %c0_i32, %c0_i32_0 : i32, i32, i32
  }
  func.func @transform_1(%arg0: i32, %arg1: i32) -> (i32, i32) {
    %c0_i32 = arith.constant 0 : i32
    %c0_i32_0 = arith.constant 0 : i32
    %c0_i32_1 = arith.constant 0 : i32
    return %c0_i32, %c0_i32_0 : i32, i32
  }
  func.func @transform_2(%arg0: i32, %arg1: i32) -> (i32, i32) {
    %c0_i32 = arith.constant 0 : i32
    %c0_i32_0 = arith.constant 0 : i32
    %c0_i32_1 = arith.constant 0 : i32
    return %c0_i32, %c0_i32_0 : i32, i32
  }
  func.func @transform_3(%arg0: i32, %arg1: i32) -> (i32, i32) {
    %c0_i32 = arith.constant 0 : i32
    %c0_i32_0 = arith.constant 0 : i32
    %c0_i32_1 = arith.constant 0 : i32
    return %c0_i32, %c0_i32_0 : i32, i32
  }
  func.func @transform_4(%arg0: i32, %arg1: i32) -> (i32, i32) {
    %c0_i32 = arith.constant 0 : i32
    %c0_i32_0 = arith.constant 0 : i32
    %c0_i32_1 = arith.constant 0 : i32
    return %c0_i32, %c0_i32_0 : i32, i32
  }
  func.func @transform_5(%arg0: i32, %arg1: i32) -> (i32, i32) {
    %c0_i32 = arith.constant 0 : i32
    %c0_i32_0 = arith.constant 0 : i32
    %c0_i32_1 = arith.constant 0 : i32
    return %c0_i32, %c0_i32_0 : i32, i32
  }
  func.func @transform_6(%arg0: i32, %arg1: i32) -> (i32, i32) {
    %c0_i32 = arith.constant 0 : i32
    %c0_i32_0 = arith.constant 0 : i32
    %c0_i32_1 = arith.constant 0 : i32
    return %c0_i32, %c0_i32_0 : i32, i32
  }
  func.func @transform_7(%arg0: i32, %arg1: i32) -> (i32, i32) {
    %c0_i32 = arith.constant 0 : i32
    %c0_i32_0 = arith.constant 0 : i32
    %c0_i32_1 = arith.constant 0 : i32
    return %c0_i32, %c0_i32_0 : i32, i32
  }
  func.func @transform_8(%arg0: i32, %arg1: i32) -> (i32, i32) {
    %c0_i32 = arith.constant 0 : i32
    %c0_i32_0 = arith.constant 0 : i32
    %c0_i32_1 = arith.constant 0 : i32
    return %c0_i32, %c0_i32_0 : i32, i32
  }
  func.func @transform_9(%arg0: i32, %arg1: i32) -> (i32, i32) {
    %c0_i32 = arith.constant 0 : i32
    %c0_i32_0 = arith.constant 0 : i32
    %c0_i32_1 = arith.constant 0 : i32
    return %c0_i32, %c0_i32_0 : i32, i32
  }
  func.func @transform_10(%arg0: i32, %arg1: i32) -> (i32, i32) {
    %c0_i32 = arith.constant 0 : i32
    %c0_i32_0 = arith.constant 0 : i32
    %c0_i32_1 = arith.constant 0 : i32
    return %c0_i32, %c0_i32_0 : i32, i32
  }
  func.func @transform_11(%arg0: i32, %arg1: i32) -> (i32, i32) {
    %c0_i32 = arith.constant 0 : i32
    %c0_i32_0 = arith.constant 0 : i32
    %c0_i32_1 = arith.constant 0 : i32
    return %c0_i32, %c0_i32_0 : i32, i32
  }
  func.func @transform_12(%arg0: i32, %arg1: i32) -> (i32, i32) {
    %c0_i32 = arith.constant 0 : i32
    %c0_i32_0 = arith.constant 0 : i32
    %c0_i32_1 = arith.constant 0 : i32
    return %c0_i32, %c0_i32_0 : i32, i32
  }
  func.func @transform_13(%arg0: i32, %arg1: i32) -> (i32, i32) {
    %c0_i32 = arith.constant 0 : i32
    %c0_i32_0 = arith.constant 0 : i32
    %c0_i32_1 = arith.constant 0 : i32
    return %c0_i32, %c0_i32_0 : i32, i32
  }
  func.func @transform_14(%arg0: i32, %arg1: i32) -> (i32, i32) {
    %c0_i32 = arith.constant 0 : i32
    %c0_i32_0 = arith.constant 0 : i32
    %c0_i32_1 = arith.constant 0 : i32
    return %c0_i32, %c0_i32_0 : i32, i32
  }
  func.func @transform_15(%arg0: i32, %arg1: i32) -> (i32, i32) {
    %c0_i32 = arith.constant 0 : i32
    %c0_i32_0 = arith.constant 0 : i32
    %c0_i32_1 = arith.constant 0 : i32
    return %c0_i32, %c0_i32_0 : i32, i32
  }
  func.func @transform_16(%arg0: i32, %arg1: i32) -> (i32, i32) {
    %c0_i32 = arith.constant 0 : i32
    %c0_i32_0 = arith.constant 0 : i32
    %c0_i32_1 = arith.constant 0 : i32
    return %c0_i32, %c0_i32_0 : i32, i32
  }
  func.func @transform_17(%arg0: i32, %arg1: i32) -> (i32, i32) {
    %c0_i32 = arith.constant 0 : i32
    %c0_i32_0 = arith.constant 0 : i32
    %c0_i32_1 = arith.constant 0 : i32
    return %c0_i32, %c0_i32_0 : i32, i32
  }
  func.func @transform_18(%arg0: i32, %arg1: i32) -> (i32, i32) {
    %c0_i32 = arith.constant 0 : i32
    %c0_i32_0 = arith.constant 0 : i32
    %c0_i32_1 = arith.constant 0 : i32
    return %c0_i32, %c0_i32_0 : i32, i32
  }
  func.func @transform_19(%arg0: i32, %arg1: i32) -> (i32, i32, i32) {
    %c0_i32 = arith.constant 0 : i32
    %c0_i32_0 = arith.constant 0 : i32
    %c0_i32_1 = arith.constant 0 : i32
    return %arg1, %c0_i32, %c0_i32_0 : i32, i32, i32
  }
  func.func @transform_20(%arg0: i32, %arg1: i32) -> (i32, i32, i32) {
    %c0_i32 = arith.constant 0 : i32
    %c0_i32_0 = arith.constant 0 : i32
    %c0_i32_1 = arith.constant 0 : i32
    return %arg1, %c0_i32, %c0_i32_0 : i32, i32, i32
  }
  func.func @transform_21(%arg0: i32, %arg1: i32) -> (i32, i32, i32) {
    %c0_i32 = arith.constant 0 : i32
    %c0_i32_0 = arith.constant 0 : i32
    %c0_i32_1 = arith.constant 0 : i32
    return %arg1, %c0_i32, %c0_i32_0 : i32, i32, i32
  }
  func.func @transform_22(%arg0: i32, %arg1: i32) -> (i32, i32, i32) {
    %c0_i32 = arith.constant 0 : i32
    %c0_i32_0 = arith.constant 0 : i32
    %c0_i32_1 = arith.constant 0 : i32
    return %arg1, %c0_i32, %c0_i32_0 : i32, i32, i32
  }
  func.func @transform_23(%arg0: i32, %arg1: i32) -> (i32, i32) {
    %c0_i32 = arith.constant 0 : i32
    %c0_i32_0 = arith.constant 0 : i32
    %c0_i32_1 = arith.constant 0 : i32
    return %c0_i32, %c0_i32_0 : i32, i32
  }
  func.func @transform_24(%arg0: i32, %arg1: i32) -> (i32, i32) {
    %c0_i32 = arith.constant 0 : i32
    %c0_i32_0 = arith.constant 0 : i32
    %c0_i32_1 = arith.constant 0 : i32
    return %c0_i32, %c0_i32_0 : i32, i32
  }
  func.func @transform_25(%arg0: i32, %arg1: i32) -> (i32, i32) {
    %c0_i32 = arith.constant 0 : i32
    %c0_i32_0 = arith.constant 0 : i32
    %c0_i32_1 = arith.constant 0 : i32
    return %c0_i32, %c0_i32_0 : i32, i32
  }
  func.func @transform_26(%arg0: i32, %arg1: i32) -> (i32, i32) {
    %c0_i32 = arith.constant 0 : i32
    %c0_i32_0 = arith.constant 0 : i32
    %c0_i32_1 = arith.constant 0 : i32
    return %c0_i32, %c0_i32_0 : i32, i32
  }
  func.func @transform_27(%arg0: i32, %arg1: i32) -> (i32, i32) {
    %c0_i32 = arith.constant 0 : i32
    %c0_i32_0 = arith.constant 0 : i32
    %c0_i32_1 = arith.constant 0 : i32
    return %c0_i32, %c0_i32_0 : i32, i32
  }
  func.func @transform_28(%arg0: i32, %arg1: i32) -> (i32, i32) {
    %c0_i32 = arith.constant 0 : i32
    %c0_i32_0 = arith.constant 0 : i32
    %c0_i32_1 = arith.constant 0 : i32
    return %c0_i32, %c0_i32_0 : i32, i32
  }
  func.func @transform_29(%arg0: i32, %arg1: i32) -> (i32, i32) {
    %c0_i32 = arith.constant 0 : i32
    %c0_i32_0 = arith.constant 0 : i32
    %c0_i32_1 = arith.constant 0 : i32
    return %c0_i32, %c0_i32_0 : i32, i32
  }
  func.func @transform_30(%arg0: i32, %arg1: i32) -> (i32, i32) {
    %c0_i32 = arith.constant 0 : i32
    %c0_i32_0 = arith.constant 0 : i32
    %c0_i32_1 = arith.constant 0 : i32
    return %c0_i32, %c0_i32_0 : i32, i32
  }
  func.func @transform_31(%arg0: i32, %arg1: i32) -> (i32, i32, i32) {
    %c0_i32 = arith.constant 0 : i32
    %c0_i32_0 = arith.constant 0 : i32
    %c0_i32_1 = arith.constant 0 : i32
    return %arg0, %c0_i32, %c0_i32_0 : i32, i32, i32
  }
}

</mosaic_0001>

<bundles_post_ra>
// kernel: tpu_custom_call.1
= control target key start
LH: loop header
LB: loop body
LE: loop exit
PB: predicated region body
PF: predicated region fallthrough
CT: control target
= control target key end

     0   :  { %s2754_s6 = smov 1   ;;  %s2755_s10 = smov 2   ;;  %s3216_s0 = inlined_call_operand.smem [shape: u32[32], index: -1, kind: input, shape index: {}] }
   0x1   :  { %s2800_s5 = sld [smem:[%s3216_s0]]   ;;  %s2756_s14 = smov 3  }
   0x2   :  { %s2805_s9 = sld [smem:[%s3216_s0 + %s2754_s6]]   ;;  %s2757_s18 = smov 4  }
   0x3   :  { %s2810_s13 = sld [smem:[%s3216_s0 + %s2755_s10]]   ;;  %s2758_s22 = smov 5  }
   0x4   :  { %s2815_s17 = sld [smem:[%s3216_s0 + %s2756_s14]]   ;;  %s2759_s26 = smov 6  }
   0x5   :  { %s2820_s21 = sld [smem:[%s3216_s0 + %s2757_s18]]   ;;  %s2760_s30 = smov 7  }
   0x6   :  { %s2825_s25 = sld [smem:[%s3216_s0 + %s2758_s22]]   ;;  %s2761_s4 = smov 8  }
   0x7   :  { %s2830_s29 = sld [smem:[%s3216_s0 + %s2759_s26]]   ;;  %s2762_s10 = smov 9  }
   0x8   :  { %s2835_s3 = sld [smem:[%s3216_s0 + %s2760_s30]]   ;;  %s2763_s15 = smov 10  }
   0x9   :  { %s2840_s8 = sld [smem:[%s3216_s0 + %s2761_s4]]   ;;  %s2764_s20 = smov 11  }
   0xa   :  { %s2845_s14 = sld [smem:[%s3216_s0 + %s2762_s10]]   ;;  %s2765_s26 = smov 12  }
   0xb   :  { %s2850_s19 = sld [smem:[%s3216_s0 + %s2763_s15]]   ;;  %s2766_s1 = smov 13  }
   0xc   :  { %s2855_s24 = sld [smem:[%s3216_s0 + %s2764_s20]]   ;;  %s2767_s7 = smov 14  }
   0xd   :  { %s2860_s30 = sld [smem:[%s3216_s0 + %s2765_s26]]   ;;  %s2768_s15 = smov 15  }
   0xe   :  { %3224 = sst [smem:[#allocation11_spill]] %s2835_s3  ;;  %s2769_s22 = smov 16  }
   0xf   :  { %s2865_s6 = sld [smem:[%s3216_s0 + %s2766_s1]]   ;;  %s2770_s28 = smov 17  }
  0x10   :  { %3225 = sst [smem:[#allocation12_spill]] %s2845_s14  ;;  %s2772_s16 = smov 19  }
  0x11   :  { %s2870_s12 = sld [smem:[%s3216_s0 + %s2767_s7]]   ;;  %s2771_s7 = smov 18  }
  0x12   :  { %3226 = sst [smem:[#allocation13_spill]] %s2855_s24  ;;  %s2773_s23 = smov 20  }
  0x13   :  { %s2875_s20 = sld [smem:[%s3216_s0 + %s2768_s15]]   ;;  %s2774_s1 = smov 21  }
  0x14   :  { %s2880_s27 = sld [smem:[%s3216_s0 + %s2769_s22]]   ;;  %s2775_s10 = smov 22  }
  0x15   :  { %3227 = sst [smem:[#allocation14_spill]] %s2865_s6  ;;  %s2780_s15 = smov 27  }
  0x16   :  { %s2885_s4 = sld [smem:[%s3216_s0 + %s2770_s28]]   ;;  %s2783_s3 = smov 30  }
  0x17   :  { %3228 = sst [smem:[#allocation15_spill]] %s2870_s12 }
  0x18   :  { %s2349_s12 = sld [smem:[%s3216_s0 + %s2771_s7]]  }
  0x19   :  { %3229 = sst [smem:[#allocation16_spill]] %s2875_s20 }
  0x1a   :  { %3230 = sst [smem:[#allocation17_spill]] %s2880_s27 }
  0x1b   :  { %s2893_s20 = sld [smem:[%s3216_s0 + %s2772_s16]]   ;;  %s2776_s16 = smov 23  }
  0x1c   :  { %3231 = sst [smem:[#allocation18_spill]] %s2885_s4 }
  0x1d   :  { %s2898_s27 = sld [smem:[%s3216_s0 + %s2773_s23]]   ;;  %s2777_s23 = smov 24  }
  0x1e   :  { %s2903_s4 = sld [smem:[%s3216_s0 + %s2774_s1]]   ;;  %v68_v0 = vstv %s2349_s12  ;;  %s2778_s1 = smov 25  }
  0x1f   :  { %s2908_s14 = sld [smem:[%s3216_s0 + %s2775_s10]]   ;;  %69 = vst [vmem:[#allocation7] sm:$0x1] %v68_v0  ;;  %s2779_s10 = smov 26  }
  0x20   :  { %s2913_s24 = sld [smem:[%s3216_s0 + %s2776_s16]]   ;;  %s2781_s12 = smov 28  }
  0x21   :  { %s2918_s6 = sld [smem:[%s3216_s0 + %s2777_s23]]  }
  0x22   :  { %s2923_s7 = sld [smem:[%s3216_s0 + %s2778_s1]]   ;;  %s2782_s1 = smov 29  }
  0x23   :  { %s2928_s16 = sld [smem:[%s3216_s0 + %s2779_s10]]  }
  0x24   :  { %s2933_s23 = sld [smem:[%s3216_s0 + %s2780_s15]]  }
  0x25   :  { %s2938_s28 = sld [smem:[%s3216_s0 + %s2781_s12]]  }
  0x26   :  { %3232 = sst [smem:[#allocation19_spill]] %s2913_s24  ;;  %s2784_s24 = smov 31  }
  0x27   :  { %3233 = sst [smem:[#allocation20_spill]] %s2918_s6 }
  0x28   :  { %3234 = sst [smem:[#allocation21_spill]] %s2923_s7 }
  0x29   :  { %3235 = sst [smem:[#allocation22_spill]] %s2928_s16 }
  0x2a   :  { %3236 = sst [smem:[#allocation23_spill]] %s2933_s23 }
  0x2b   :  { %s2943_s7 = sld [smem:[%s3216_s0 + %s2782_s1]]  }
  0x2c   :  { %s2948_s16 = sld [smem:[%s3216_s0 + %s2783_s3]]  }
  0x2d   :  { %s2953_s23 = sld [smem:[%s3216_s0 + %s2784_s24]]  }
  0x2e   :  { %70 = vsyncpa [#allocation9], 0  ;;  %s2955_s12 = smov 0   ;;  %s2957_s22 = smov 0  }
  0x2f   :  { %s2959_s6 = smov 0  }
  0x30 LB: > { %s85_s26 = sadd.s32 1, %s2748_s22  ;;  %p2367_p1 = scmp.ge.s32.totalorder %s2752_s6, 1  ;;  %s2752_s6 = sphi %s2959_s6, %s76_s6   ;;  %s2748_s22 = sphi %s2957_s22, %s3257_s22   ;;  %s2744_s12 = sphi %s2955_s12, %s3256_s12  }
  0x31   : > { %p86_p0 = scmp.ge.s32.totalorder %s85_s26, 4  ;;  %p921_p2 = scmp.lt.s32.totalorder %s2752_s6, 5 }
  0x33   : > { %s3259_s26 = smov (%p86_p0, %s85_s26), 0  ;;  %p922_p3 = pnand %p2367_p1, %p921_p2 }
  0x34   : > { %p1018_p4 = scmp.lt.s32.totalorder (!%p922_p3), %s2744_s12, 3  ;;  %p2372_p5 = scmp.ne.s32.totalorder (!%p922_p3), %s2744_s12, 0 }
  0x35   : > { %925 = sbr.rel (%p922_p3) target bundleno = 2748 (0xabc), region = 144 }
  0x3a   : > { %s2978_s1 = scalar_select %p1018_p4, %s2744_s12, 3 }
  0x3b   : > { %1039 = sbr.rel (%p2372_p5) target bundleno = 2110 (0x83e), region = 148  ;;  %s3237_s18 = sld [smem:[#allocation11_spill]] (!%p2372_p5) }
  0x3c   : > { %s2524_s2 = sshll.u32 %s2978_s1, 4  ;;  %s2525_s11 = sshll.u32 %s2978_s1, 6 }
  0x3d   : > { %s2984_s10 = scalar_lea.vmem %s2893_s20, %s2524_s2  ;;  %s2988_s24 = scalar_lea.vmem %s2903_s4, %s2525_s11 }
  0x3e   : > { %s3238_s2 = sld [smem:[#allocation14_spill]] (!%p2372_p5) }
  0x3f   : > { %s3239_s11 = sld [smem:[#allocation13_spill]] (!%p2372_p5) }
  0x40   : > { %v2994_v1 = vld [vmem:[%s2800_s5] sm:$0xff]  ;;  %vm1044_vm0 = vcmask 261120   ;;  %v2785_v3 = vmov 0.0   ;;  %v3001_v4 = vld [vmem:[%s2800_s5 + $0x8] sm:$0xff]  ;;  %v2786_v6 = vmov 32.0   ;;  %s3240_s0 = sld [smem:[#allocation12_spill]] }
  0x41   : > { %v1045_v2 = vsel %vm1044_vm0, %v2994_v1, 0.0  ;;  %1903 = vst.msk [vmem:[#allocation6] sm:$0xff] %vm1044_vm0, %v2785_v3  ;;  %v1048_v5 = vsel %vm1044_vm0, %v3001_v4, 0.0  ;;  %2640 = vrcp.f32 %v2786_v6  ;;  %v2527_v23 = vld [vmem:[%s2815_s17 + $0x8] sm:$0xff]  ;;  %v2526_v25 = vld [vmem:[%s2815_s17] sm:$0xff]  ;;  %s3247_s15 = sld [smem:[#allocation20_spill]] }
  0x42   : > { %1904 = vst.msk [vmem:[#allocation6 + $0x8] sm:$0xff] %vm1044_vm0, %v2785_v3  ;;  %1046 = vadd.xlane.f32.xlu0 %v1045_v2  ;;  %1136 = vmatpush.bf16.msra.mxu0 %v2527_v23  ;;  %v2626_v44 = vld [vmem:[%s2805_s9] ss:$0 sm:$0xff]  ;;  %s3248_s3 = sld [smem:[#allocation22_spill]] }
  0x43   : > { %v2627_v49 = vld [vmem:[%s2810_s13] ss:$0 sm:$0xff] }
  0x44   : > { %v2628_v54 = vld [vmem:[%s2820_s21] ss:$0 sm:$0xff] }
  0x46   : > { %1137 = vmatpush.bf16.msra.mxu0 %v2526_v25 }
  0x47   : > { %v2641_v7 = vpop.eup %2640 }
  0x48   : > { %v1052_v8 = vmul.f32 32.0, %v2641_v7  ;;  %vm1056_vm1 = vweird.f32 %v2641_v7 }
  0x4a   : > { %1049 = vadd.xlane.f32.xlu0 %v1048_v5  ;;  %v1053_v9 = vsub.f32 1.0, %v1052_v8 }
  0x4c   : > { %v1054_v10 = vmul.f32 %v2641_v7, %v1053_v9 }
  0x4e   : > { %v1055_v11 = vadd.f32 %v2641_v7, %v1054_v10 }
  0x50   : > { %v3005_v12 = vsel %vm1056_vm1, %v2641_v7, %v1055_v11  ;;  %v2531_v11 = vld [vmem:[%s2825_s25 + $0x18] sm:$0xff]  ;;  %vm1269_vm1 = vcmask 523264  }
  0x51   : > { %1277 = vmatpush.bf16.msra.mxu1 %v2531_v11 }
  0xb5   : > { %v1047_v13 = vpop.xlane.xlu0 %1046 }
  0xb6   : > { %v1058_v14 = vmul.f32 %v3005_v12, %v1047_v13 }
  0xb8   : > { %v1060_v15 = vsub.f32 %v2994_v1, %v1058_v14 }
  0xba   : > { %v1062_v16 = vmul.f32 %v1060_v15, %v1060_v15 }
  0xbc   : > { %v1064_v17 = vsel %vm1044_vm0, %v1062_v16, 0.0 }
  0xbd   : > { %1065 = vadd.xlane.f32.xlu1 %v1064_v17  ;;  %v1050_v18 = vpop.xlane.xlu0 %1049 }
  0xbe   : > { %v1059_v19 = vmul.f32 %v3005_v12, %v1050_v18 }
  0xc0   : > { %v1061_v20 = vsub.f32 %v3001_v4, %v1059_v19 }
  0xc2   : > { %v1063_v21 = vmul.f32 %v1061_v20, %v1061_v20 }
  0xc4   : > { %v1067_v22 = vsel %vm1044_vm0, %v1063_v21, 0.0 }
  0xc5   : > { %1068 = vadd.xlane.f32.xlu1 %v1067_v22 }
 0x130   : > { %v1066_v24 = vpop.xlane.xlu1 %1065 }
 0x131   : > { %v1070_v26 = vmul.f32 %v1066_v24, %v3005_v12 }
 0x133   : > { %v1072_v27 = vadd.f32 1e-05, %v1070_v26 }
 0x135   : > { %2642 = vrsqrt.f32 %v1072_v27  ;;  %vm1080_vm3 = vweird.f32 %v1072_v27 }
 0x138   : > { %v1069_v28 = vpop.xlane.xlu1 %1068 }
 0x139   : > { %v1071_v29 = vmul.f32 %v1069_v28, %v3005_v12  ;;  %v2529_v28 = vld [vmem:[%s2825_s25 + $0x8] sm:$0xff] }
 0x13b   : > { %v2643_v30 = vpop.eup %2642  ;;  %v1073_v31 = vadd.f32 1e-05, %v1071_v29 }
 0x13c   : > { %v1075_v32 = vmul.f32 %v2643_v30, %v1072_v27  ;;  %vm1081_vm2 = vweird.f32 %v2643_v30 }
 0x13d   : > { %2644 = vrsqrt.f32 %v1073_v31  ;;  %vm1082_vm4 = vmor %vm1080_vm3, %vm1081_vm2  ;;  %vm1090_vm6 = vweird.f32 %v1073_v31  ;;  %vm1440_vm2 = vcmask 1043456   ;;  %vm1424_vm3 = vcmask 64512  }
 0x13e   : > { %v1076_v33 = vmul.f32 %v2643_v30, %v1075_v32 }
 0x140   : > { %v1077_v34 = vmul.f32 0.5, %v1076_v33 }
 0x142   : > { %v1078_v35 = vsub.f32 1.5, %v1077_v34  ;;  %v2528_v34 = vld [vmem:[%s2825_s25] sm:$0xff] }
 0x143   : > { %v2645_v36 = vpop.eup %2644 }
 0x144   : > { %v1079_v37 = vmul.f32 %v2643_v30, %v1078_v35  ;;  %v1085_v38 = vmul.f32 %v2645_v36, %v1073_v31  ;;  %vm1091_vm5 = vweird.f32 %v2645_v36 }
 0x145   : > { %vm1092_vm7 = vmor %vm1090_vm6, %vm1091_vm5 }
 0x146   : > { %v1086_v39 = vmul.f32 %v2645_v36, %v1085_v38  ;;  %v1083_v40 = vsel %vm1082_vm4, %v2643_v30, %v1079_v37  ;;  %vm1896_vm4 = vcmask 257024  }
 0x147   : > { %v1094_v43 = vmul.f32 %v1083_v40, %v1060_v15 }
 0x148   : > { %v1087_v41 = vmul.f32 0.5, %v1086_v39 }
 0x149   : > { %v1099_v48 = vmul.f32 %v2626_v44, %v1094_v43 }
 0x14a   : > { %v1088_v42 = vsub.f32 1.5, %v1087_v41 }
 0x14b   : > { %v1104_v51 = vadd.f32 %v2627_v49, %v1099_v48 }
 0x14c   : > { %v1089_v45 = vmul.f32 %v2645_v36, %v1088_v42 }
 0x14e   : > { %v1093_v46 = vsel %vm1092_vm7, %v2645_v36, %v1089_v45 }
 0x14f   : > { %v1095_v47 = vmul.f32 %v1093_v46, %v1061_v20  ;;  %v2530_v20 = vld [vmem:[%s2825_s25 + $0x10] sm:$0xff] }
 0x150   : > { %1278 = vmatpush.bf16.msra.mxu1 %v2530_v20 }
 0x151   : > { %v1100_v50 = vmul.f32 %v2626_v44, %v1095_v47 }
 0x153   : > { %v1105_v52 = vadd.f32 %v2627_v49, %v1100_v50 }
 0x154   : > { %1279 = vmatpush.bf16.msra.mxu1 %v2529_v28 }
 0x155   : > { %v1106_v53 = vpack.c.bf16 %v1105_v52, %v1104_v51 }
 0x157   : > { %2381 = vmatmul.msk.bf16.vlgmr.msra.gmra.mxu0 %vm1044_vm0, %v1106_v53 }
 0x158   : > { %1280 = vmatpush.bf16.msra.mxu1 %v2528_v34 }
 0x1d4   : > { %v1139_v55 = vpop.f32.mrf.mxu0 }
 0x1d5   : > { %v3021_v56 = vadd.f32 %v2628_v54, %v1139_v55 }
 0x1d7   : > { %v3024_v57 = vmul.f32 0.70710677, %v3021_v56 }
 0x1d9   : > { %v1148_v58 = vmul.f32 %v3024_v57, %v3024_v57 }
 0x1db   : > { %v1149_v59 = vmin.f32 %v1148_v58, 16.0 }
 0x1dc   : > { %v1141_v60 = vpop.f32.mrf.mxu0 }
 0x1dd   : > { %v1150_v61 = vmul.f32 2.1237322e-06, %v1149_v59  ;;  %v1161_v62 = vmul.f32 3.8918573e-05, %v1149_v59  ;;  %v3028_v63 = vadd.f32 %v2628_v54, %v1141_v60 }
 0x1df   : > { %v1151_v0 = vadd.f32 0.00028619796, %v1150_v61  ;;  %v1162_v2 = vadd.f32 0.001143296, %v1161_v62  ;;  %v3031_v3 = vmul.f32 0.70710677, %v3028_v63 }
 0x1e1   : > { %v1163_v5 = vmul.f32 %v1162_v2, %v1149_v59  ;;  %v1188_v6 = vmul.f32 %v3031_v3, %v3031_v3  ;;  %v1152_v7 = vmul.f32 %v1151_v0, %v1149_v59 }
 0x1e3   : > { %v1164_v8 = vadd.f32 0.014752088, %v1163_v5  ;;  %v1189_v9 = vmin.f32 %v1188_v6, 16.0  ;;  %v1153_v15 = vadd.f32 0.0036580483, %v1152_v7 }
 0x1e5   : > { %v1165_v10 = vmul.f32 %v1164_v8, %v1149_v59  ;;  %v1190_v13 = vmul.f32 2.1237322e-06, %v1189_v9  ;;  %v1201_v14 = vmul.f32 3.8918573e-05, %v1189_v9  ;;  %v1154_v23 = vmul.f32 %v1153_v15, %v1149_v59 }
 0x1e7   : > { %v1166_v16 = vadd.f32 0.112945676, %v1165_v10  ;;  %v1191_v17 = vadd.f32 0.00028619796, %v1190_v13  ;;  %v1202_v18 = vadd.f32 0.001143296, %v1201_v14 }
 0x1e8   : > { %v1155_v30 = vadd.f32 0.05243302, %v1154_v23  ;;  %v2535_v23 = vld [vmem:[%s2850_s19 + $0x8] sm:$0xff] }
 0x1e9   : > { %v1167_v19 = vmul.f32 %v1166_v16, %v1149_v59  ;;  %v1192_v21 = vmul.f32 %v1191_v17, %v1189_v9  ;;  %v1203_v22 = vmul.f32 %v1202_v18, %v1189_v9  ;;  %v1144_v17 = vmul.f32 0.5, %v3021_v56  ;;  %1358 = vmatpush.bf16.msra.mxu3 %v2535_v23  ;;  %v2536_v56 = vld [vmem:[%s2860_s30] sm:$0xff] }
 0x1ea   : > { %v1156_v36 = vmul.f32 %v1155_v30, %v1149_v59  ;;  %v1145_v18 = vmul.f32 0.5, %v3028_v63 }
 0x1eb   : > { %v1168_v24 = vadd.f32 0.4994258, %v1167_v19  ;;  %v1193_v25 = vadd.f32 0.0036580483, %v1192_v21  ;;  %v1204_v26 = vadd.f32 0.014752088, %v1203_v22 }
 0x1ec   : > { %v1157_v41 = vadd.f32 0.18741608, %v1156_v36  ;;  %v2533_v22 = vld [vmem:[%s2840_s8 + $0x8] sm:$0xff] }
 0x1ed   : > { %v1169_v27 = vmul.f32 %v1168_v24, %v1149_v59  ;;  %v1205_v29 = vmul.f32 %v1204_v26, %v1189_v9  ;;  %v1194_v32 = vmul.f32 %v1193_v25, %v1189_v9  ;;  %v2537_v24 = vld [vmem:[%s2860_s30 + $0x8] sm:$0xff]  ;;  %1322 = vmatpush.bf16.msra.mxu2 %v2533_v22  ;;  %v2532_v25 = vld [vmem:[%s2840_s8] sm:$0xff] }
 0x1ee   : > { %v1158_v46 = vmul.f32 %v1157_v41, %v1149_v59  ;;  %1394 = vmatpush.bf16.msrb.mxu0 %v2537_v24  ;;  %v2534_v26 = vld [vmem:[%s2850_s19] sm:$0xff] }
 0x1ef   : > { %v1170_v31 = vadd.f32 1.0, %v1169_v27  ;;  %v1206_v33 = vadd.f32 0.112945676, %v1205_v29  ;;  %v1195_v37 = vadd.f32 0.05243302, %v1194_v32  ;;  %1359 = vmatpush.bf16.msra.mxu3 %v2534_v26  ;;  %v1289_v32 = vld [vmem:[%s3237_s18] sm:$0xff] }
 0x1f0   : > { %v1159_v52 = vadd.f32 1.1283791, %v1158_v46  ;;  %v2629_v27 = vld [vmem:[%s2830_s29] ss:$0 sm:$0xff]  ;;  %s3242_s18 = sld [smem:[#allocation17_spill]] }
 0x1f1   : > { %2646 = vrcp.f32 %v1170_v31  ;;  %v1207_v35 = vmul.f32 %v1206_v33, %v1189_v9  ;;  %v1196_v43 = vmul.f32 %v1195_v37, %v1189_v9  ;;  %v1182_v48 = vand.u32 2147483648, %v1170_v31  ;;  %1323 = vmatpush.bf16.msra.mxu2 %v2532_v25  ;;  %v2630_v37 = vld [vmem:[%s3238_s2] ss:$0 sm:$0xff]  ;;  %s3243_s2 = sld [smem:[#allocation16_spill]] }
 0x1f2   : > { %v1180_v50 = vand.u32 2147483647, %v1170_v31  ;;  %vm1176_vm9 = vweird.f32 %v1170_v31  ;;  %v1160_v62 = vmul.f32 %v1159_v52, %v3024_v57  ;;  %1395 = vmatpush.bf16.msrb.mxu0 %v2536_v56 }
 0x1f3   : > { %v1208_v38 = vadd.f32 0.4994258, %v1207_v35  ;;  %v1197_v49 = vadd.f32 0.18741608, %v1196_v43  ;;  %v1183_v55 = vor.u32 1.1754944e-38, %v1182_v48 }
 0x1f4   : > { %vm1181_vm11 = vcmp.eq.f32.partialorder %v1180_v50, 8.507059e+37 }
 0x1f5   : > { %v1209_v39 = vmul.f32 %v1208_v38, %v1189_v9  ;;  %v1198_v58 = vmul.f32 %v1197_v49, %v1189_v9 }
 0x1f7   : > { %v2647_v40 = vpop.eup %2646  ;;  %v1210_v44 = vadd.f32 1.0, %v1209_v39  ;;  %v1199_v59 = vadd.f32 1.1283791, %v1198_v58 }
 0x1f8   : > { %v1172_v42 = vmul.f32 %v2647_v40, %v1170_v31  ;;  %vm1177_vm8 = vweird.f32 %v2647_v40 }
 0x1f9   : > { %2648 = vrcp.f32 %v1210_v44  ;;  %vm1178_vm10 = vmor %vm1176_vm9, %vm1177_vm8  ;;  %v1222_v2 = vand.u32 2147483648, %v1210_v44  ;;  %v1220_v7 = vand.u32 2147483647, %v1210_v44  ;;  %vm1216_vm13 = vweird.f32 %v1210_v44 }
 0x1fa   : > { %v1173_v45 = vsub.f32 1.0, %v1172_v42  ;;  %v1200_v9 = vmul.f32 %v1199_v59, %v3031_v3  ;;  %vm1613_vm9 = vcmask 31744  }
 0x1fb   : > { %v1223_v10 = vor.u32 1.1754944e-38, %v1222_v2  ;;  %vm1221_vm15 = vcmp.eq.f32.partialorder %v1220_v7, 8.507059e+37 }
 0x1fc   : > { %v1174_v47 = vmul.f32 %v2647_v40, %v1173_v45 }
 0x1fe   : > { %v1175_v51 = vadd.f32 %v2647_v40, %v1174_v47 }
 0x1ff   : > { %v2649_v53 = vpop.eup %2648 }
 0x200   : > { %v1179_v54 = vsel %vm1178_vm10, %v2647_v40, %v1175_v51  ;;  %v1212_v60 = vmul.f32 %v2649_v53, %v1210_v44  ;;  %vm1217_vm12 = vweird.f32 %v2649_v53  ;;  %v2632_v40 = vld [vmem:[%s3239_s11] ss:$0 sm:$0xff]  ;;  %s3244_s11 = sld [smem:[#allocation18_spill]] }
 0x201   : > { %v1184_v61 = vsel %vm1181_vm11, %v1183_v55, %v1179_v54  ;;  %vm1218_vm14 = vmor %vm1216_vm13, %vm1217_vm12  ;;  %v2631_v44 = vld [vmem:[%s3240_s0] ss:$0 sm:$0xff]  ;;  %s3241_s0 = sld [smem:[#allocation15_spill]] }
 0x202   : > { %v1213_v0 = vsub.f32 1.0, %v1212_v60  ;;  %v1185_v5 = vmul.f32 %v1184_v61, %v1160_v62 }
 0x204   : > { %v1214_v6 = vmul.f32 %v2649_v53, %v1213_v0  ;;  %v2382_v11 = vclamps-f32 %v1185_v5, 1.0 }
 0x206   : > { %v1215_v8 = vadd.f32 %v2649_v53, %v1214_v6  ;;  %v1228_v15 = vadd.f32 1.0, %v2382_v11 }
 0x208   : > { %v1219_v13 = vsel %vm1218_vm14, %v2649_v53, %v1215_v8  ;;  %v1230_v20 = vmul.f32 %v1228_v15, %v1144_v17 }
 0x209   : > { %v1224_v57 = vsel %vm1221_vm15, %v1223_v10, %v1219_v13 }
 0x20a   : > { %v1225_v14 = vmul.f32 %v1224_v57, %v1200_v9 }
 0x20c   : > { %v2383_v16 = vclamps-f32 %v1225_v14, 1.0 }
 0x20e   : > { %v1229_v19 = vadd.f32 1.0, %v2383_v16 }
 0x210   : > { %v1231_v21 = vmul.f32 %v1229_v19, %v1145_v18 }
 0x212   : > { %v1232_v3 = vpack.c.bf16 %v1231_v21, %v1230_v20  ;;  %v2539_v20 = vld [vmem:[%s3241_s0 + $0x8] sm:$0xff] }
 0x214   : > { %2400 = vmatmul.msk.bf16.vlgmr.msra.gmra.mxu1 %vm1269_vm1, %v1232_v3 }
 0x291   : > { %v1282_v63 = vpop.f32.mrf.mxu1 }
 0x292   : > { %v1283_v28 = vadd.f32 %v2629_v27, %v1282_v63  ;;  %v2538_v63 = vld [vmem:[%s3241_s0] sm:$0xff] }
 0x294   : > { %v1287_v30 = vadd.f32 %v1283_v28, %v2994_v1 }
 0x296   : > { %v1290_v34 = vadd.f32 %v1289_v32, %v1287_v30 }
 0x299   : > { %v1284_v29 = vpop.f32.mrf.mxu1 }
 0x29a   : > { %v1285_v31 = vadd.f32 %v2629_v27, %v1284_v29 }
 0x29c   : > { %v1288_v33 = vadd.f32 %v1285_v31, %v3001_v4 }
 0x29e   : > { %v1291_v35 = vadd.f32 %v1289_v32, %v1288_v33  ;;  %v2541_v32 = vld [vmem:[%s3242_s18 + $0x8] sm:$0xff]  ;;  %v2540_v33 = vld [vmem:[%s3242_s18] sm:$0xff] }
 0x2a0   : > { %v1292_v36 = vpack.c.bf16 %v1291_v35, %v1290_v34  ;;  %v2787_v34 = vmov 0   ;;  %v2633_v35 = vld [vmem:[%s3243_s2] ss:$0 sm:$0xff]  ;;  %s3245_s2 = sld [smem:[#allocation21_spill]] }
 0x2a1   : > { %2625 = vset.pattern.permute.xlu0 %v2787_v34 }
 0x2a2   : > { %2409 = vmatmul.msk.bf16.vlgmr.msra.gmra.mxu2 %vm1044_vm0, %v1292_v36  ;;  %2418 = vmatmul.msk.bf16.vlgmr.msra.gmra.mxu3 %vm1044_vm0, %v1292_v36 }
 0x2a3   : > { %2427 = vmatmul.msk.bf16.vlgmr.msrb.gmra.mxu0 %vm1044_vm0, %v1292_v36 }
 0x320   : > { %v1397_v38 = vpop.f32.mrf.mxu0 }
 0x321   : > { %v1398_v39 = vadd.f32 %v2630_v37, %v1397_v38 }
 0x323   : > { %v1402_v1 = vpack.c.bf16 %v1398_v39, %v1398_v39 }
 0x325   : > { %v1361_v41 = vpop.f32.mrf.mxu3  ;;  %v1442_v42 = vsel %vm1440_vm2, %v1402_v1, 0  ;;  %v1325_v4 = vpop.f32.mrf.mxu2 }
 0x326   : > { %v1362_v43 = vadd.f32 %v2632_v40, %v1361_v41  ;;  %1451 = vmatpush.bf16.msrb.mxu3 %v1442_v42  ;;  %v1326_v50 = vadd.f32 %v2631_v44, %v1325_v4 }
 0x328   : > { %v1366_v45 = vpack.c.bf16 %v1362_v43, %v1362_v43  ;;  %v1399_v46 = vpop.f32.mrf.mxu0  ;;  %v1330_v54 = vpack.c.bf16 %v1326_v50, %v1326_v50 }
 0x329   : > { %v1400_v47 = vadd.f32 %v2630_v37, %v1399_v46 }
 0x32a   : > { %v1408_v48 = vsel %vm1044_vm0, %v1366_v45, 0  ;;  %1582 = vmatpush.bf16.msra.mxu3 %v2541_v32  ;;  %v2634_v45 = vld [vmem:[#allocation7] ss:$0 sm:$0xff] }
 0x32b   : > { %v1403_v49 = vpack.c.bf16 %v1400_v47, %v1400_v47  ;;  %1417 = vmatpush.bf16.xpose.msrb.mxu2 %v1408_v48 }
 0x32d   : > { %v1493_v51 = vsel %vm1440_vm2, %v1403_v49, 0  ;;  %v1363_v52 = vpop.f32.mrf.mxu3  ;;  %v1327_v58 = vpop.f32.mrf.mxu2 }
 0x32e   : > { %v1364_v53 = vadd.f32 %v2632_v40, %v1363_v52  ;;  %1502 = vmatpush.bf16.msra.mxu0 %v1493_v51  ;;  %v1328_v61 = vadd.f32 %v2631_v44, %v1327_v58  ;;  %1583 = vmatpush.bf16.msra.mxu3 %v2540_v33 }
 0x330   : > { %v1367_v55 = vpack.c.bf16 %v1364_v53, %v1364_v53  ;;  %v1331_v62 = vpack.c.bf16 %v1328_v61, %v1328_v61 }
 0x332   : > { %2428 = vmatmul.msk.bf16.vlgmr.msrb.gmra.mxu2 %vm1044_vm0, %v1330_v54  ;;  %v1461_v60 = vsel %vm1044_vm0, %v1367_v55, 0 }
 0x333   : > { %1470 = vmatpush.bf16.xpose.msrb.mxu1 %v1461_v60  ;;  %1538 = vmatpush.bf16.msra.mxu2 %v2539_v20 }
 0x337   : > { %1539 = vmatpush.bf16.msra.mxu2 %v2538_v63 }
 0x33a   : > { %2430 = vmatmul.msk.bf16.vlgmr.msrb.gmra.mxu1 %vm1044_vm0, %v1331_v62 }
 0x3b5   : > { %v1419_v0 = vpop.f32.mrf.mxu2 }
 0x3b6   : > { %v1423_v59 = vmul.f32 0.17677669, %v1419_v0 }
 0x3b7   : > { %v1472_v2 = vpop.f32.mrf.mxu1 }
 0x3b8   : > { %v1425_v5 = vsel %vm1424_vm3, %v1423_v59, -inf  ;;  %v1476_v6 = vmul.f32 0.17677669, %v1472_v2 }
 0x3b9   : > { %1426 = vmax.xlane.f32.xlu2 %v1425_v5 }
 0x3ba   : > { %v1477_v10 = vsel %vm1424_vm3, %v1476_v6, -inf }
 0x3bd   : > { %v1421_v7 = vpop.f32.mrf.mxu2 }
 0x3bf   : > { %v1474_v8 = vpop.f32.mrf.mxu1 }
 0x3c1   : > { %1478 = vmax.xlane.f32.xlu2 %v1477_v10 }
 0x42c   : > { %v1427_v11 = vpop.xlane.xlu2 %1426 }
 0x42d   : > { %v1428_v9 = vsub.f32 %v1423_v59, %v1427_v11 }
 0x42f   : > { %v1429_v13 = vmul.f32 1.442695, %v1428_v9 }
 0x431   : > { %2650 = vpow2.f32 %v1429_v13 }
 0x434   : > { %v1479_v57 = vpop.xlane.xlu2 %1478 }
 0x435   : > { %v1480_v14 = vsub.f32 %v1476_v6, %v1479_v57  ;;  %v2635_v6 = vld [vmem:[%s3244_s11] ss:$0 sm:$0xff]  ;;  %s3246_s11 = sld [smem:[#allocation19_spill]] }
 0x437   : > { %v2651_v15 = vpop.eup %2650  ;;  %v1481_v16 = vmul.f32 1.442695, %v1480_v14 }
 0x438   : > { %v1431_v17 = vsel %vm1424_vm3, %v2651_v15, 0.0 }
 0x439   : > { %2652 = vpow2.f32 %v1481_v16  ;;  %1432 = vadd.xlane.f32.xlu0 %v1431_v17 }
 0x43f   : > { %v2653_v18 = vpop.eup %2652 }
 0x440   : > { %v1483_v19 = vsel %vm1424_vm3, %v2653_v18, 0.0 }
 0x441   : > { %1484 = vadd.xlane.f32.xlu1 %v1483_v19 }
 0x4ac   : > { %v1433_v21 = vpop.xlane.xlu0 %1432 }
 0x4ad   : > { %2654 = vrcp.f32 %v1433_v21 }
 0x4b3   : > { %v2655_v3 = vpop.eup %2654 }
 0x4b4   : > { %v1435_v22 = vmul.f32 %v2655_v3, %v2651_v15  ;;  %v1485_v23 = vpop.xlane.xlu1 %1484  ;;  %v2542_v3 = vld [vmem:[%s3245_s2] sm:$0xff] }
 0x4b5   : > { %2656 = vrcp.f32 %v1485_v23 }
 0x4b6   : > { %v1436_v24 = vpack.c.bf16 %v1435_v22, %v1435_v22 }
 0x4b8   : > { %2429 = vmatmul.msk.bf16.vlgmr.msrb.gmra.mxu3 %vm1424_vm3, %v1436_v24 }
 0x4bb   : > { %v2657_v25 = vpop.eup %2656 }
 0x4bc   : > { %v1487_v26 = vmul.f32 %v2657_v25, %v2653_v18  ;;  %v2543_v18 = vld [vmem:[%s3245_s2 + $0x8] sm:$0xff] }
 0x4bd   : > { %1722 = vmatpush.bf16.msra.mxu1 %v2543_v18 }
 0x4be   : > { %v1488_v56 = vpack.c.bf16 %v1487_v26, %v1487_v26 }
 0x4c0   : > { %2431 = vmatmul.msk.bf16.vlgmr.msra.gmra.mxu0 %vm1424_vm3, %v1488_v56 }
 0x4c1   : > { %1723 = vmatpush.bf16.msra.mxu1 %v2542_v3 }
 0x53b   : > { %v1453_v27 = vpop.f32.mrf.mxu3 }
 0x53d   : > { %v1504_v28 = vpop.f32.mrf.mxu0 }
 0x53e   : > { %v1508_v29 = vpack.c.bf16 %v1504_v28, %v1453_v27 }
 0x540   : > { %2440 = vmatmul.msk.bf16.vlgmr.msra.gmra.mxu2 %vm1044_vm0, %v1508_v29 }
 0x543   : > { %v1455_v30 = vpop.f32.mrf.mxu3 }
 0x545   : > { %v1506_v31 = vpop.f32.mrf.mxu0 }
 0x5c3   : > { %v1541_v36 = vpop.f32.mrf.mxu2 }
 0x5c4   : > { %v1542_v37 = vadd.f32 %v2633_v35, %v1541_v36 }
 0x5c6   : > { %v1546_v38 = vpack.c.bf16 %v1542_v37, %v1542_v37  ;;  %1894 = vst.msk [vmem:[#allocation2] sm:$0xff] %vm1044_vm0, %v1542_v37  ;;  %v1638_v39 = vsel %vm1044_vm0, %v1542_v37, 0.0 }
 0x5c7   : > { %1639 = vadd.xlane.f32.xlu2 %v1638_v39 }
 0x5c8   : > { %1897 = vst.msk [vmem:[#allocation3] sm:$0xf] %vm1896_vm4, %v1546_v38  ;;  %v1558_v43 = vunpack.c.l.b16 %v1546_v38  ;;  %v2637_v38 = vld [vmem:[%s3247_s15] ss:$0 sm:$0xff] }
 0x5cb   : > { %v1543_v40 = vpop.f32.mrf.mxu2 }
 0x5cc   : > { %v1544_v1 = vadd.f32 %v2633_v35, %v1543_v40 }
 0x5ce   : > { %v1547_v41 = vpack.c.bf16 %v1544_v1, %v1544_v1  ;;  %1895 = vst.msk [vmem:[#allocation2 + $0x8] sm:$0xff] %vm1044_vm0, %v1544_v1  ;;  %v1641_v42 = vsel %vm1044_vm0, %v1544_v1, 0.0 }
 0x5cf   : > { %1642 = vadd.xlane.f32.xlu0 %v1641_v42 }
 0x5d0   : > { %v1559_v4 = vunpack.c.l.b16 %v1547_v41  ;;  %1898 = vst.msk [vmem:[#allocation3 + $0x4] sm:$0xf] %vm1896_vm4, %v1547_v41 }
 0x5d2   : > { %v1560_v44 = vpack.c.b16 %v1559_v4, %v1558_v43 }
 0x5d4   : > { %2449 = vmatmul.msk.bf16.vlgmr.msra.gmra.mxu3 %vm1044_vm0, %v1560_v44 }
 0x5e3   : > { %1594 = vperm.xlu0 %2625, %v2634_v45  }
 0x63a   : > { %v1640_v46 = vpop.xlane.xlu2 %1639 }
 0x63b   : > { %v1644_v47 = vmul.f32 %v1640_v46, %v3005_v12 }
 0x63d   : > { %v3081_v48 = vsub.f32 %v1542_v37, %v1644_v47 }
 0x63f   : > { %v1648_v49 = vmul.f32 %v3081_v48, %v3081_v48 }
 0x641   : > { %v1650_v50 = vsel %vm1044_vm0, %v1648_v49, 0.0 }
 0x642   : > { %v1643_v51 = vpop.xlane.xlu0 %1642  ;;  %1651 = vadd.xlane.f32.xlu1 %v1650_v50 }
 0x643   : > { %v1645_v52 = vmul.f32 %v1643_v51, %v3005_v12 }
 0x645   : > { %v3087_v53 = vsub.f32 %v1544_v1, %v1645_v52 }
 0x647   : > { %v1649_v54 = vmul.f32 %v3087_v53, %v3087_v53 }
 0x649   : > { %v1653_v55 = vsel %vm1044_vm0, %v1649_v54, 0.0 }
 0x64a   : > { %1654 = vadd.xlane.f32.xlu2 %v1653_v55 }
 0x655   : > { %v1595_v58 = vpop.permute.xlu0 %1594 }
 0x656   : > { %2658 = vrcp.f32 %v1595_v58  ;;  %v1608_v0 = vand.u32 2147483648, %v1595_v58  ;;  %vm1602_vm5 = vweird.f32 %v1595_v58  ;;  %v1606_v2 = vand.u32 2147483647, %v1595_v58 }
 0x657   : > { %v1585_v60 = vpop.f32.mrf.mxu3 }
 0x658   : > { %v1609_v7 = vor.u32 1.1754944e-38, %v1608_v0  ;;  %vm1607_vm8 = vcmp.eq.f32.partialorder %v1606_v2, 8.507059e+37  ;;  %v1586_v11 = vadd.f32 %v2635_v6, %v1585_v60 }
 0x65c   : > { %v2659_v61 = vpop.eup %2658 }
 0x65d   : > { %v1598_v62 = vmul.f32 %v2659_v61, %v1595_v58  ;;  %vm1603_vm6 = vweird.f32 %v2659_v61 }
 0x65e   : > { %vm1604_vm7 = vmor %vm1602_vm5, %vm1603_vm6 }
 0x65f   : > { %v1599_v59 = vsub.f32 1.0, %v1598_v62  ;;  %v1587_v8 = vpop.f32.mrf.mxu3 }
 0x660   : > { %v1588_v9 = vadd.f32 %v2635_v6, %v1587_v8 }
 0x661   : > { %v1600_v5 = vmul.f32 %v2659_v61, %v1599_v59 }
 0x663   : > { %v1601_v10 = vadd.f32 %v2659_v61, %v1600_v5 }
 0x665   : > { %v1605_v13 = vsel %vm1604_vm7, %v2659_v61, %v1601_v10 }
 0x666   : > { %v1610_v57 = vsel %vm1607_vm8, %v1609_v7, %v1605_v13 }
 0x667   : > { %v1612_v14 = vmul.f32 %v1610_v57, %v1588_v9  ;;  %v1611_v15 = vmul.f32 %v1610_v57, %v1586_v11 }
 0x669   : > { %v1617_v16 = vsel %vm1613_vm9, %v1612_v14, -inf  ;;  %v1614_v17 = vsel %vm1613_vm9, %v1611_v15, -inf }
 0x66a   : > { %1618 = vmax.xlane.f32.xlu2 %v1617_v16  ;;  %1615 = vmax.xlane.f32.xlu1 %v1614_v17 }
 0x6b5   : > { %v1652_v19 = vpop.xlane.xlu1 %1651 }
 0x6b6   : > { %v1656_v20 = vmul.f32 %v1652_v19, %v3005_v12 }
 0x6b8   : > { %v1658_v21 = vadd.f32 1e-05, %v1656_v20 }
 0x6ba   : > { %2660 = vrsqrt.f32 %v1658_v21  ;;  %vm1666_vm11 = vweird.f32 %v1658_v21 }
 0x6bd   : > { %v1655_v22 = vpop.xlane.xlu2 %1654 }
 0x6be   : > { %v1657_v23 = vmul.f32 %v1655_v22, %v3005_v12  ;;  %v2636_v12 = vld [vmem:[%s3246_s11] ss:$0 sm:$0xff] }
 0x6c0   : > { %v2661_v24 = vpop.eup %2660  ;;  %v1659_v25 = vadd.f32 1e-05, %v1657_v23 }
 0x6c1   : > { %v1661_v26 = vmul.f32 %v2661_v24, %v1658_v21  ;;  %vm1667_vm10 = vweird.f32 %v2661_v24 }
 0x6c2   : > { %2662 = vrsqrt.f32 %v1659_v25  ;;  %vm1668_vm12 = vmor %vm1666_vm11, %vm1667_vm10  ;;  %vm1676_vm14 = vweird.f32 %v1659_v25 }
 0x6c3   : > { %v1662_v56 = vmul.f32 %v2661_v24, %v1661_v26 }
 0x6c5   : > { %v1663_v63 = vmul.f32 0.5, %v1662_v56 }
 0x6c7   : > { %v1664_v27 = vsub.f32 1.5, %v1663_v63 }
 0x6c8   : > { %v2663_v28 = vpop.eup %2662 }
 0x6c9   : > { %v1665_v29 = vmul.f32 %v2661_v24, %v1664_v27  ;;  %v1671_v30 = vmul.f32 %v2663_v28, %v1659_v25  ;;  %vm1677_vm13 = vweird.f32 %v2663_v28 }
 0x6ca   : > { %vm1678_vm15 = vmor %vm1676_vm14, %vm1677_vm13 }
 0x6cb   : > { %v1672_v31 = vmul.f32 %v2663_v28, %v1671_v30  ;;  %v1669_v32 = vsel %vm1668_vm12, %v2661_v24, %v1665_v29 }
 0x6cc   : > { %v1680_v35 = vmul.f32 %v1669_v32, %v3081_v48 }
 0x6cd   : > { %v1673_v33 = vmul.f32 0.5, %v1672_v31 }
 0x6ce   : > { %v1685_v39 = vmul.f32 %v2636_v12, %v1680_v35 }
 0x6cf   : > { %v1674_v34 = vsub.f32 1.5, %v1673_v33 }
 0x6d0   : > { %v1690_v41 = vadd.f32 %v2637_v38, %v1685_v39 }
 0x6d1   : > { %v1675_v36 = vmul.f32 %v2663_v28, %v1674_v34 }
 0x6d3   : > { %v1679_v37 = vsel %vm1678_vm15, %v2663_v28, %v1675_v36 }
 0x6d4   : > { %v1681_v40 = vmul.f32 %v1679_v37, %v3087_v53  ;;  %v2638_v53 = vld [vmem:[%s3248_s3] ss:$0 sm:$0xff]  ;;  %s3249_s3 = sld [smem:[#allocation23_spill]] }
 0x6d6   : > { %v1686_v1 = vmul.f32 %v2636_v12, %v1681_v40 }
 0x6d8   : > { %v1691_v42 = vadd.f32 %v2637_v38, %v1686_v1 }
 0x6da   : > { %v1692_v43 = vpack.c.bf16 %v1691_v42, %v1690_v41  ;;  %v2545_v31 = vld [vmem:[%s3249_s3 + $0x8] sm:$0xff]  ;;  %v2544_v36 = vld [vmem:[%s3249_s3] sm:$0xff] }
 0x6db   : > { %1848 = vmatpush.bf16.msrb.mxu0 %v2545_v31 }
 0x6dc   : > { %2458 = vmatmul.msk.bf16.vlgmr.msra.gmra.mxu1 %vm1044_vm0, %v1692_v43 }
 0x6dd   : > { %v1619_v4 = vpop.xlane.xlu2 %1618  ;;  %v1616_v44 = vpop.xlane.xlu1 %1615 }
 0x6de   : > { %v1621_v45 = vsub.f32 %v1612_v14, %v1619_v4  ;;  %v1620_v46 = vsub.f32 %v1611_v15, %v1616_v44 }
 0x6df   : > { %1849 = vmatpush.bf16.msrb.mxu0 %v2544_v36 }
 0x6e0   : > { %v1624_v47 = vmul.f32 1.442695, %v1621_v45  ;;  %v1622_v48 = vmul.f32 1.442695, %v1620_v46 }
 0x6e2   : > { %2664 = vpow2.f32 %v1624_v47 }
 0x6e3   : > { %2666 = vpow2.f32 %v1622_v48 }
 0x6e8   : > { %v2665_v49 = vpop.eup %2664 }
 0x6e9   : > { %v2667_v50 = vpop.eup %2666  ;;  %v1629_v51 = vsel %vm1613_vm9, %v2665_v49, 0.0 }
 0x6ea   : > { %1630 = vadd.xlane.f32.xlu2 %v1629_v51  ;;  %v1626_v52 = vsel %vm1613_vm9, %v2667_v50, 0.0 }
 0x6eb   : > { %1627 = vadd.xlane.f32.xlu1 %v1626_v52 }
 0x759   : > { %v1725_v54 = vpop.f32.mrf.mxu1 }
 0x75a   : > { %v3107_v55 = vadd.f32 %v2638_v53, %v1725_v54 }
 0x75c   : > { %v3110_v58 = vmul.f32 0.70710677, %v3107_v55 }
 0x75d   : > { %v1631_v60 = vpop.xlane.xlu2 %1630 }
 0x75e   : > { %v1734_v61 = vmul.f32 %v3110_v58, %v3110_v58  ;;  %2668 = vrcp.f32 %v1631_v60  ;;  %v1628_v62 = vpop.xlane.xlu1 %1627 }
 0x75f   : > { %2670 = vrcp.f32 %v1628_v62 }
 0x760   : > { %v1735_v0 = vmin.f32 %v1734_v61, 16.0 }
 0x761   : > { %v1727_v59 = vpop.f32.mrf.mxu1 }
 0x762   : > { %v1736_v2 = vmul.f32 2.1237322e-06, %v1735_v0  ;;  %v1747_v5 = vmul.f32 3.8918573e-05, %v1735_v0  ;;  %v3114_v6 = vadd.f32 %v2638_v53, %v1727_v59 }
 0x764   : > { %v2669_v7 = vpop.eup %2668  ;;  %v1737_v8 = vadd.f32 0.00028619796, %v1736_v2  ;;  %v1748_v10 = vadd.f32 0.001143296, %v1747_v5  ;;  %v3117_v13 = vmul.f32 0.70710677, %v3114_v6 }
 0x765   : > { %v2671_v11 = vpop.eup %2670  ;;  %v1635_v9 = vmul.f32 %v2669_v7, %v2665_v49 }
 0x766   : > { %v1749_v57 = vmul.f32 %v1748_v10, %v1735_v0  ;;  %v1634_v14 = vmul.f32 %v2671_v11, %v2667_v50  ;;  %v1774_v15 = vmul.f32 %v3117_v13, %v3117_v13  ;;  %v1738_v16 = vmul.f32 %v1737_v8, %v1735_v0 }
 0x767   : > { %1902 = vst.msk [vmem:[#allocation5 + $0x8] sm:$0xff] %vm1613_vm9, %v1635_v9 }
 0x768   : > { %v1750_v17 = vadd.f32 0.014752088, %v1749_v57  ;;  %1901 = vst.msk [vmem:[#allocation5] sm:$0xff] %vm1613_vm9, %v1634_v14  ;;  %v1775_v18 = vmin.f32 %v1774_v15, 16.0  ;;  %v1739_v3 = vadd.f32 0.0036580483, %v1738_v16 }
 0x76a   : > { %v1751_v19 = vmul.f32 %v1750_v17, %v1735_v0  ;;  %v1776_v20 = vmul.f32 2.1237322e-06, %v1775_v18  ;;  %v1787_v21 = vmul.f32 3.8918573e-05, %v1775_v18  ;;  %v1740_v63 = vmul.f32 %v1739_v3, %v1735_v0 }
 0x76c   : > { %v1752_v22 = vadd.f32 0.112945676, %v1751_v19  ;;  %v1777_v23 = vadd.f32 0.00028619796, %v1776_v20  ;;  %v1788_v24 = vadd.f32 0.001143296, %v1787_v21 }
 0x76d   : > { %v1741_v33 = vadd.f32 0.05243302, %v1740_v63  ;;  %v1730_v20 = vmul.f32 0.5, %v3107_v55  ;;  %v1731_v21 = vmul.f32 0.5, %v3114_v6 }
 0x76e   : > { %v1753_v25 = vmul.f32 %v1752_v22, %v1735_v0  ;;  %v1778_v26 = vmul.f32 %v1777_v23, %v1775_v18  ;;  %v1789_v56 = vmul.f32 %v1788_v24, %v1775_v18 }
 0x76f   : > { %v1742_v38 = vmul.f32 %v1741_v33, %v1735_v0 }
 0x770   : > { %v1754_v27 = vadd.f32 0.4994258, %v1753_v25  ;;  %v1779_v28 = vadd.f32 0.0036580483, %v1778_v26  ;;  %v1790_v29 = vadd.f32 0.014752088, %v1789_v56 }
 0x771   : > { %v1743_v42 = vadd.f32 0.18741608, %v1742_v38  ;;  %v2639_v25 = vld [vmem:[%s2938_s28] ss:$0 sm:$0xff] }
 0x772   : > { %v1755_v30 = vmul.f32 %v1754_v27, %v1735_v0  ;;  %v1791_v32 = vmul.f32 %v1790_v29, %v1775_v18  ;;  %v1780_v12 = vmul.f32 %v1779_v28, %v1775_v18 }
 0x773   : > { %v1744_v46 = vmul.f32 %v1743_v42, %v1735_v0 }
 0x774   : > { %v1756_v34 = vadd.f32 1.0, %v1755_v30  ;;  %v1792_v35 = vadd.f32 0.112945676, %v1791_v32  ;;  %v1781_v39 = vadd.f32 0.05243302, %v1780_v12 }
 0x775   : > { %v1745_v52 = vadd.f32 1.1283791, %v1744_v46 }
 0x776   : > { %2672 = vrcp.f32 %v1756_v34  ;;  %v1793_v37 = vmul.f32 %v1792_v35, %v1775_v18  ;;  %v1782_v4 = vmul.f32 %v1781_v39, %v1775_v18  ;;  %v1768_v48 = vand.u32 2147483648, %v1756_v34 }
 0x777   : > { %v1766_v50 = vand.u32 2147483647, %v1756_v34  ;;  %vm1762_vm2 = vweird.f32 %v1756_v34  ;;  %v1746_v2 = vmul.f32 %v1745_v52, %v3110_v58 }
 0x778   : > { %v1794_v40 = vadd.f32 0.4994258, %v1793_v37  ;;  %v1783_v49 = vadd.f32 0.18741608, %v1782_v4  ;;  %v1769_v60 = vor.u32 1.1754944e-38, %v1768_v48 }
 0x779   : > { %vm1767_vm4 = vcmp.eq.f32.partialorder %v1766_v50, 8.507059e+37 }
 0x77a   : > { %v1795_v1 = vmul.f32 %v1794_v40, %v1775_v18  ;;  %v1784_v61 = vmul.f32 %v1783_v49, %v1775_v18 }
 0x77c   : > { %v2673_v41 = vpop.eup %2672  ;;  %v1796_v44 = vadd.f32 1.0, %v1795_v1  ;;  %v1785_v0 = vadd.f32 1.1283791, %v1784_v61 }
 0x77d   : > { %v1758_v43 = vmul.f32 %v2673_v41, %v1756_v34  ;;  %vm1763_vm1 = vweird.f32 %v2673_v41 }
 0x77e   : > { %2674 = vrcp.f32 %v1796_v44  ;;  %vm1764_vm3 = vmor %vm1762_vm2, %vm1763_vm1  ;;  %v1808_v7 = vand.u32 2147483648, %v1796_v44  ;;  %v1806_v11 = vand.u32 2147483647, %v1796_v44  ;;  %vm1802_vm6 = vweird.f32 %v1796_v44 }
 0x77f   : > { %v1759_v45 = vsub.f32 1.0, %v1758_v43  ;;  %v1786_v15 = vmul.f32 %v1785_v0, %v3117_v13 }
 0x780   : > { %v1809_v57 = vor.u32 1.1754944e-38, %v1808_v7  ;;  %vm1807_vm8 = vcmp.eq.f32.partialorder %v1806_v11, 8.507059e+37 }
 0x781   : > { %v1760_v47 = vmul.f32 %v2673_v41, %v1759_v45 }
 0x783   : > { %v1761_v51 = vadd.f32 %v2673_v41, %v1760_v47 }
 0x784   : > { %v2675_v53 = vpop.eup %2674 }
 0x785   : > { %v1765_v54 = vsel %vm1764_vm3, %v2673_v41, %v1761_v51  ;;  %v1798_v62 = vmul.f32 %v2675_v53, %v1796_v44  ;;  %vm1803_vm5 = vweird.f32 %v2675_v53 }
 0x786   : > { %v1770_v59 = vsel %vm1767_vm4, %v1769_v60, %v1765_v54  ;;  %vm1804_vm7 = vmor %vm1802_vm6, %vm1803_vm5 }
 0x787   : > { %v1799_v5 = vsub.f32 1.0, %v1798_v62  ;;  %v1771_v8 = vmul.f32 %v1770_v59, %v1746_v2 }
 0x789   : > { %v1800_v10 = vmul.f32 %v2675_v53, %v1799_v5  ;;  %v2459_v14 = vclamps-f32 %v1771_v8, 1.0 }
 0x78b   : > { %v1801_v9 = vadd.f32 %v2675_v53, %v1800_v10  ;;  %v1814_v58 = vadd.f32 1.0, %v2459_v14 }
 0x78d   : > { %v1805_v16 = vsel %vm1804_vm7, %v2675_v53, %v1801_v9  ;;  %v1816_v22 = vmul.f32 %v1814_v58, %v1730_v20 }
 0x78e   : > { %v1810_v17 = vsel %vm1807_vm8, %v1809_v57, %v1805_v16 }
 0x78f   : > { %v1811_v18 = vmul.f32 %v1810_v17, %v1786_v15 }
 0x791   : > { %v2460_v19 = vclamps-f32 %v1811_v18, 1.0 }
 0x793   : > { %v1815_v3 = vadd.f32 1.0, %v2460_v19 }
 0x795   : > { %v1817_v23 = vmul.f32 %v1815_v3, %v1731_v21 }
 0x797   : > { %v1818_v24 = vpack.c.bf16 %v1817_v23, %v1816_v22 }
 0x799   : > { %2469 = vmatmul.msk.bf16.vlgmr.msrb.gmra.mxu0 %vm1044_vm0, %v1818_v24 }
 0x816   : > { %v1851_v26 = vpop.f32.mrf.mxu0 }
 0x817   : > { %v1852_v56 = vadd.f32 %v2639_v25, %v1851_v26 }
 0x819   : > { %v2470_v13 = vmul.f32 -1.442695, %v1852_v56 }
 0x81b   : > { %2676 = vpow2.f32 %v2470_v13 }
 0x81e   : > { %v1853_v63 = vpop.f32.mrf.mxu0 }
 0x81f   : > { %v1854_v27 = vadd.f32 %v2639_v25, %v1853_v63 }
 0x821   : > { %v2677_v28 = vpop.eup %2676  ;;  %v2471_v29 = vmul.f32 -1.442695, %v1854_v27 }
 0x822   : > { %v1862_v30 = vadd.f32 1.0, %v2677_v28 }
 0x823   : > { %2678 = vpow2.f32 %v2471_v29 }
 0x824   : > { %2680 = vrcp.f32 %v1862_v30  ;;  %v1875_v34 = vand.u32 2147483648, %v1862_v30  ;;  %v1873_v35 = vand.u32 2147483647, %v1862_v30  ;;  %vm1869_vm10 = vweird.f32 %v1862_v30 }
 0x826   : > { %v1876_v38 = vor.u32 1.1754944e-38, %v1875_v34  ;;  %vm1874_vm12 = vcmp.eq.f32.partialorder %v1873_v35, 8.507059e+37 }
 0x829   : > { %v2679_v55 = vpop.eup %2678 }
 0x82a   : > { %v2681_v6 = vpop.eup %2680  ;;  %v1863_v31 = vadd.f32 1.0, %v2679_v55 }
 0x82b   : > { %v1865_v32 = vmul.f32 %v2681_v6, %v1862_v30  ;;  %vm1870_vm9 = vweird.f32 %v2681_v6 }
 0x82c   : > { %2682 = vrcp.f32 %v1863_v31  ;;  %vm1871_vm11 = vmor %vm1869_vm10, %vm1870_vm9  ;;  %v1890_v42 = vand.u32 2147483648, %v1863_v31  ;;  %v1888_v4 = vand.u32 2147483647, %v1863_v31  ;;  %vm1884_vm14 = vweird.f32 %v1863_v31 }
 0x82d   : > { %v1866_v33 = vsub.f32 1.0, %v1865_v32 }
 0x82e   : > { %v1891_v45 = vor.u32 1.1754944e-38, %v1890_v42  ;;  %vm1889_vm1 = vcmp.eq.f32.partialorder %v1888_v4, 8.507059e+37 }
 0x82f   : > { %v1867_v12 = vmul.f32 %v2681_v6, %v1866_v33 }
 0x831   : > { %v1868_v36 = vadd.f32 %v2681_v6, %v1867_v12 }
 0x832   : > { %v2683_v37 = vpop.eup %2682 }
 0x833   : > { %v1872_v39 = vsel %vm1871_vm11, %v2681_v6, %v1868_v36  ;;  %v1880_v40 = vmul.f32 %v2683_v37, %v1863_v31  ;;  %vm1885_vm13 = vweird.f32 %v2683_v37 }
 0x834   : > { %v1877_v1 = vsel %vm1874_vm12, %v1876_v38, %v1872_v39  ;;  %vm1886_vm15 = vmor %vm1884_vm14, %vm1885_vm13 }
 0x835   : > { %1899 = vst.msk [vmem:[#allocation4] sm:$0xff] %vm1044_vm0, %v1877_v1  ;;  %v1881_v41 = vsub.f32 1.0, %v1880_v40 }
 0x837   : > { %v1882_v43 = vmul.f32 %v2683_v37, %v1881_v41 }
 0x839   : > { %v1883_v44 = vadd.f32 %v2683_v37, %v1882_v43 }
 0x83b   : > { %v1887_v46 = vsel %vm1886_vm15, %v2683_v37, %v1883_v44 }
 0x83c   : > { %v1892_v47 = vsel %vm1889_vm1, %v1891_v45, %v1887_v46 }
 0x83d   : > { %1900 = vst.msk [vmem:[#allocation4 + $0x8] sm:$0xff] %vm1044_vm0, %v1892_v47 }
 0x83e PF: > { %v2548_v48 = vld [vmem:[%s2984_s10 + $0x8] sm:$0xff]  ;;  %v2547_v49 = vld [vmem:[%s2984_s10] sm:$0xff]  ;;  %v2546_v50 = vld [vmem:[#allocation3] sm:$0xff]  ;;  %vm1932_vm2 = vcmask 261120   ;;  %s3250_s15 = scalar_lea.vmem %s2898_s27, %s2978_s1  ;;  %v2123_v39 = vlaneseq  ;;  %v2125_v1 = vstv %s2744_s12  ;;  %vm2129_vm3 = vcmask 31744   ;;  %s3253_s10 = scalar_lea.vmem %s2908_s14, %s2978_s1 }
 0x83f   : > { %1942 = vmatpush.bf16.msra.mxu0 %v2548_v48  ;;  %v2684_v51 = vld [vmem:[%s3250_s15] ss:$0 sm:$0xff]  ;;  %v2556_v52 = vld [vmem:[%s2988_s24 + $0x38] sm:$0xff]  ;;  %v2555_v61 = vld [vmem:[%s2988_s24 + $0x30] sm:$0xff]  ;;  %p2519_p6 = scmp.ne.s32.totalorder %s2744_s12, 3 }
 0x840   : > { %2107 = vmatpush.bf16.msra.mxu1 %v2556_v52  ;;  %v2554_v59 = vld [vmem:[%s2988_s24 + $0x28] sm:$0xff]  ;;  %v2553_v8 = vld [vmem:[%s2988_s24 + $0x20] sm:$0xff]  ;;  %v2552_v15 = vld [vmem:[%s2988_s24 + $0x18] sm:$0xff]  ;;  %v2124_v42 = vand.u32 127, %v2123_v39 }
 0x841   : > { %v2551_v20 = vld [vmem:[%s2988_s24 + $0x10] sm:$0xff]  ;;  %v2550_v56 = vld [vmem:[%s2988_s24 + $0x8] sm:$0xff]  ;;  %v2549_v55 = vld [vmem:[%s2988_s24] sm:$0xff] }
 0x842   : > { %v2121_v44 = vld [vmem:[#allocation5] sm:$0xff]  ;;  %vm3162_vm0 = vcmp.eq.s32.totalorder %v2124_v42, %v2125_v1 }
 0x843   : > { %1943 = vmatpush.bf16.msra.mxu0 %v2547_v49  ;;  %v2127_v49 = vsel %vm3162_vm0, %v2121_v44, 0.0 }
 0x844   : > { %2108 = vmatpush.bf16.msra.mxu1 %v2555_v61  ;;  %v2130_v52 = vsel %vm2129_vm3, %v2127_v49, 0.0 }
 0x845   : > { %2131 = vadd.xlane.f32.xlu0 %v2130_v52 }
 0x846   : > { %2484 = vmatmul.msk.bf16.vlgmr.msra.gmra.mxu0 %vm1932_vm2, %v2546_v50 }
 0x848   : > { %2109 = vmatpush.bf16.msra.mxu1 %v2554_v59 }
 0x84c   : > { %2110 = vmatpush.bf16.msra.mxu1 %v2553_v8 }
 0x850   : > { %2111 = vmatpush.bf16.msra.mxu1 %v2552_v15 }
 0x854   : > { %2112 = vmatpush.bf16.msra.mxu1 %v2551_v20 }
 0x858   : > { %2113 = vmatpush.bf16.msra.mxu1 %v2550_v56 }
 0x85c   : > { %2114 = vmatpush.bf16.msra.mxu1 %v2549_v55 }
 0x8c3   : > { %v1945_v53 = vpop.f32.mrf.mxu0 }
 0x8c4   : > { %v3140_v54 = vadd.f32 %v2684_v51, %v1945_v53  ;;  %v2122_v53 = vld [vmem:[#allocation5 + $0x8] sm:$0xff] }
 0x8c6   : > { %v3143_v60 = vmul.f32 0.70710677, %v3140_v54 }
 0x8c8   : > { %v1954_v62 = vmul.f32 %v3143_v60, %v3143_v60 }
 0x8ca   : > { %v1955_v2 = vmin.f32 %v1954_v62, 16.0 }
 0x8cb   : > { %v1947_v5 = vpop.f32.mrf.mxu0 }
 0x8cc   : > { %v1956_v0 = vmul.f32 2.1237322e-06, %v1955_v2  ;;  %v3149_v7 = vadd.f32 %v2684_v51, %v1947_v5  ;;  %v1967_v10 = vmul.f32 3.8918573e-05, %v1955_v2 }
 0x8ce   : > { %v1957_v11 = vadd.f32 0.00028619796, %v1956_v0  ;;  %v3153_v9 = vmul.f32 0.70710677, %v3149_v7  ;;  %v1968_v57 = vadd.f32 0.001143296, %v1967_v10 }
 0x8cf   : > { %v2128_v0 = vsel %vm3162_vm0, %v2122_v53, 0.0 }
 0x8d0   : > { %v1994_v14 = vmul.f32 %v3153_v9, %v3153_v9  ;;  %v1958_v16 = vmul.f32 %v1957_v11, %v1955_v2  ;;  %v1969_v17 = vmul.f32 %v1968_v57, %v1955_v2  ;;  %v2133_v15 = vsel %vm2129_vm3, %v2128_v0, 0.0 }
 0x8d1   : > { %2134 = vadd.xlane.f32.xlu0 %v2133_v15 }
 0x8d2   : > { %v1995_v18 = vmin.f32 %v1994_v14, 16.0  ;;  %v1970_v58 = vadd.f32 0.014752088, %v1969_v17  ;;  %v1959_v3 = vadd.f32 0.0036580483, %v1958_v16 }
 0x8d4   : > { %v1996_v19 = vmul.f32 2.1237322e-06, %v1995_v18  ;;  %v2007_v21 = vmul.f32 3.8918573e-05, %v1995_v18  ;;  %v1971_v22 = vmul.f32 %v1970_v58, %v1955_v2  ;;  %v1960_v63 = vmul.f32 %v1959_v3, %v1955_v2 }
 0x8d6   : > { %v1997_v23 = vadd.f32 0.00028619796, %v1996_v19  ;;  %v2008_v24 = vadd.f32 0.001143296, %v2007_v21  ;;  %v1972_v25 = vadd.f32 0.112945676, %v1971_v22 }
 0x8d7   : > { %v1961_v31 = vadd.f32 0.05243302, %v1960_v63 }
 0x8d8   : > { %v1998_v26 = vmul.f32 %v1997_v23, %v1995_v18  ;;  %v2009_v13 = vmul.f32 %v2008_v24, %v1995_v18  ;;  %v1973_v27 = vmul.f32 %v1972_v25, %v1955_v2 }
 0x8d9   : > { %v1962_v36 = vmul.f32 %v1961_v31, %v1955_v2  ;;  %v2685_v31 = vld [vmem:[%s3253_s10] ss:$0 sm:$0xff] }
 0x8da   : > { %v1999_v28 = vadd.f32 0.0036580483, %v1998_v26  ;;  %v2010_v29 = vadd.f32 0.014752088, %v2009_v13  ;;  %v1974_v30 = vadd.f32 0.4994258, %v1973_v27 }
 0x8db   : > { %v1963_v41 = vadd.f32 0.18741608, %v1962_v36  ;;  %v1950_v27 = vmul.f32 0.5, %v3140_v54 }
 0x8dc   : > { %v2011_v6 = vmul.f32 %v2010_v29, %v1995_v18  ;;  %v1975_v32 = vmul.f32 %v1974_v30, %v1955_v2  ;;  %v2000_v33 = vmul.f32 %v1999_v28, %v1995_v18  ;;  %v1951_v28 = vmul.f32 0.5, %v3149_v7 }
 0x8dd   : > { %v1964_v48 = vmul.f32 %v1963_v41, %v1955_v2 }
 0x8de   : > { %v2012_v34 = vadd.f32 0.112945676, %v2011_v6  ;;  %v1976_v12 = vadd.f32 1.0, %v1975_v32  ;;  %v2001_v37 = vadd.f32 0.05243302, %v2000_v33  ;;  %v2132_v32 = vpop.xlane.xlu0 %2131 }
 0x8df   : > { %v1965_v5 = vadd.f32 1.1283791, %v1964_v48 }
 0x8e0   : > { %v2013_v35 = vmul.f32 %v2012_v34, %v1995_v18  ;;  %2686 = vrcp.f32 %v1976_v12  ;;  %v2002_v43 = vmul.f32 %v2001_v37, %v1995_v18  ;;  %v1988_v61 = vand.u32 2147483648, %v1976_v12  ;;  %v2136_v34 = vld [vmem:[#allocation6] sm:$0xff] }
 0x8e1   : > { %v1986_v59 = vand.u32 2147483647, %v1976_v12  ;;  %vm1982_vm5 = vweird.f32 %v1976_v12  ;;  %v1966_v16 = vmul.f32 %v1965_v5, %v3143_v60 }
 0x8e2   : > { %v2014_v38 = vadd.f32 0.4994258, %v2013_v35  ;;  %v2003_v50 = vadd.f32 0.18741608, %v2002_v43  ;;  %v1989_v11 = vor.u32 1.1754944e-38, %v1988_v61 }
 0x8e3   : > { %vm1987_vm7 = vcmp.eq.f32.partialorder %v1986_v59, 8.507059e+37 }
 0x8e4   : > { %v2015_v40 = vmul.f32 %v2014_v38, %v1995_v18  ;;  %v2004_v10 = vmul.f32 %v2003_v50, %v1995_v18  ;;  %v2137_v38 = vld [vmem:[#allocation6 + $0x8] sm:$0xff] }
 0x8e6   : > { %v2016_v4 = vadd.f32 1.0, %v2015_v40  ;;  %v2687_v45 = vpop.eup %2686  ;;  %v2005_v19 = vadd.f32 1.1283791, %v2004_v10 }
 0x8e7   : > { %v1978_v47 = vmul.f32 %v2687_v45, %v1976_v12  ;;  %vm1983_vm4 = vweird.f32 %v2687_v45 }
 0x8e8   : > { %2688 = vrcp.f32 %v2016_v4  ;;  %vm1984_vm6 = vmor %vm1982_vm5, %vm1983_vm4  ;;  %v2028_v20 = vand.u32 2147483648, %v2016_v4  ;;  %v2026_v22 = vand.u32 2147483647, %v2016_v4  ;;  %vm2022_vm9 = vweird.f32 %v2016_v4 }
 0x8e9   : > { %v1979_v51 = vsub.f32 1.0, %v1978_v47  ;;  %v2006_v24 = vmul.f32 %v2005_v19, %v3153_v9 }
 0x8ea   : > { %v2029_v23 = vor.u32 1.1754944e-38, %v2028_v20  ;;  %vm2027_vm11 = vcmp.eq.f32.partialorder %v2026_v22, 8.507059e+37 }
 0x8eb   : > { %v1980_v62 = vmul.f32 %v2687_v45, %v1979_v51 }
 0x8ed   : > { %v1981_v2 = vadd.f32 %v2687_v45, %v1980_v62 }
 0x8ee   : > { %v2689_v8 = vpop.eup %2688 }
 0x8ef   : > { %v2018_v57 = vmul.f32 %v2689_v8, %v2016_v4  ;;  %v1985_v14 = vsel %vm1984_vm6, %v2687_v45, %v1981_v2  ;;  %vm2023_vm8 = vweird.f32 %v2689_v8 }
 0x8f0   : > { %v1990_v17 = vsel %vm1987_vm7, %v1989_v11, %v1985_v14  ;;  %vm2024_vm10 = vmor %vm2022_vm9, %vm2023_vm8 }
 0x8f1   : > { %v2019_v58 = vsub.f32 1.0, %v2018_v57  ;;  %v1991_v21 = vmul.f32 %v1990_v17, %v1966_v16 }
 0x8f3   : > { %v2020_v3 = vmul.f32 %v2689_v8, %v2019_v58  ;;  %v2485_v25 = vclamps-f32 %v1991_v21, 1.0 }
 0x8f5   : > { %v2021_v18 = vadd.f32 %v2689_v8, %v2020_v3  ;;  %v2034_v63 = vadd.f32 1.0, %v2485_v25 }
 0x8f7   : > { %v2025_v26 = vsel %vm2024_vm10, %v2689_v8, %v2021_v18  ;;  %v2036_v30 = vmul.f32 %v2034_v63, %v1950_v27 }
 0x8f8   : > { %v2030_v60 = vsel %vm2027_vm11, %v2029_v23, %v2025_v26 }
 0x8f9   : > { %v2031_v56 = vmul.f32 %v2030_v60, %v2006_v24 }
 0x8fb   : > { %v2486_v13 = vclamps-f32 %v2031_v56, 1.0 }
 0x8fd   : > { %v2035_v29 = vadd.f32 1.0, %v2486_v13 }
 0x8ff   : > { %v2037_v55 = vmul.f32 %v2035_v29, %v1951_v28 }
 0x901   : > { %v2038_v6 = vpack.c.bf16 %v2037_v55, %v2036_v30 }
 0x903   : > { %2115 = vmatmul.bf16.vlgmr.msra.gmra.mxu1 %v2038_v6 }
 0x944   : > { %v2135_v37 = vpop.xlane.xlu0 %2134 }
 0x980   : > { %v2116_v9 = vpop.f32.mrf.mxu1 }
 0x981   : > { %v2117_v33 = vadd.f32 %v2685_v31, %v2116_v9 }
 0x983   : > { %v2138_v12 = vmul.f32 %v2132_v32, %v2117_v33 }
 0x985   : > { %v2140_v35 = vadd.f32 %v2138_v12, %v2136_v34 }
 0x987   : > { %2142 = vst.msk [vmem:[#allocation6] sm:$0xff] %vm1932_vm2, %v2140_v35 }
 0x988   : > { %v2118_v36 = vpop.f32.mrf.mxu1 }
 0x989   : > { %v2119_v54 = vadd.f32 %v2685_v31, %v2118_v36 }
 0x98b   : > { %v2139_v7 = vmul.f32 %v2135_v37, %v2119_v54  ;;  %2147 = sbr.rel (%p2519_p6) target bundleno = 2731 (0xaab), region = 152 }
 0x98d   : > { %v2141_v39 = vadd.f32 %v2139_v7, %v2137_v38 }
 0x98f   : > { %2143 = vst.msk [vmem:[#allocation6 + $0x8] sm:$0xff] %vm1932_vm2, %v2141_v39 }
 0x990   : > { %v2148_v40 = vld [vmem:[#allocation4] sm:$0xff]  ;;  %v2154_v41 = vld [vmem:[#allocation2] sm:$0xff]  ;;  %v2155_v46 = vld [vmem:[#allocation2 + $0x8] sm:$0xff]  ;;  %v2788_v50 = vmov 32.0  }
 0x991   : > { %v2150_v1 = vld [vmem:[#allocation6] sm:$0xff]  ;;  %v2149_v43 = vld [vmem:[#allocation4 + $0x8] sm:$0xff]  ;;  %2692 = vrcp.f32 %v2788_v50 }
 0x992   : > { %v2152_v42 = vmul.f32 %v2150_v1, %v2148_v40  ;;  %v2690_v13 = vld [vmem:[%s2943_s7] ss:$0 sm:$0xff] }
 0x993   : > { %v2691_v28 = vld [vmem:[%s2948_s16] ss:$0 sm:$0xff] }
 0x994   : > { %v2156_v44 = vadd.f32 %v2154_v41, %v2152_v42 }
 0x996   : > { %v2151_v4 = vld [vmem:[#allocation6 + $0x8] sm:$0xff]  ;;  %v2160_v47 = vsel %vm1932_vm2, %v2156_v44, 0.0 }
 0x997   : > { %v2153_v45 = vmul.f32 %v2151_v4, %v2149_v43  ;;  %2161 = vadd.xlane.f32.xlu0 %v2160_v47  ;;  %v2693_v51 = vpop.eup %2692 }
 0x998   : > { %v2167_v52 = vmul.f32 32.0, %v2693_v51  ;;  %vm2171_vm12 = vweird.f32 %v2693_v51 }
 0x999   : > { %v2157_v48 = vadd.f32 %v2155_v46, %v2153_v45 }
 0x99a   : > { %v2168_v53 = vsub.f32 1.0, %v2167_v52 }
 0x99b   : > { %v2163_v49 = vsel %vm1932_vm2, %v2157_v48, 0.0 }
 0x99c   : > { %v2169_v61 = vmul.f32 %v2693_v51, %v2168_v53 }
 0x99e   : > { %v2170_v62 = vadd.f32 %v2693_v51, %v2169_v61 }
 0x99f   : > { %2164 = vadd.xlane.f32.xlu0 %v2163_v49 }
 0x9a0   : > { %v2172_v59 = vsel %vm2171_vm12, %v2693_v51, %v2170_v62 }
 0xa0a   : > { %v2162_v5 = vpop.xlane.xlu0 %2161 }
 0xa0b   : > { %v2173_v0 = vmul.f32 %v2172_v59, %v2162_v5 }
 0xa0d   : > { %v2175_v8 = vsub.f32 %v2156_v44, %v2173_v0 }
 0xa0f   : > { %v2177_v10 = vmul.f32 %v2175_v8, %v2175_v8 }
 0xa11   : > { %v2179_v2 = vsel %vm1932_vm2, %v2177_v10, 0.0 }
 0xa12   : > { %2180 = vadd.xlane.f32.xlu1 %v2179_v2  ;;  %v2165_v11 = vpop.xlane.xlu0 %2164 }
 0xa13   : > { %v2174_v57 = vmul.f32 %v2172_v59, %v2165_v11 }
 0xa15   : > { %v2176_v14 = vsub.f32 %v2157_v48, %v2174_v57 }
 0xa17   : > { %v2178_v15 = vmul.f32 %v2176_v14, %v2176_v14 }
 0xa19   : > { %v2182_v16 = vsel %vm1932_vm2, %v2178_v15, 0.0 }
 0xa1a   : > { %2183 = vadd.xlane.f32.xlu1 %v2182_v16 }
 0xa85   : > { %v2181_v17 = vpop.xlane.xlu1 %2180 }
 0xa86   : > { %v2185_v58 = vmul.f32 %v2181_v17, %v2172_v59 }
 0xa88   : > { %v2187_v19 = vadd.f32 1e-05, %v2185_v58 }
 0xa8a   : > { %2694 = vrsqrt.f32 %v2187_v19  ;;  %vm2195_vm14 = vweird.f32 %v2187_v19 }
 0xa8d   : > { %v2184_v20 = vpop.xlane.xlu1 %2183 }
 0xa8e   : > { %v2186_v21 = vmul.f32 %v2184_v20, %v2172_v59 }
 0xa90   : > { %v2695_v3 = vpop.eup %2694  ;;  %v2188_v22 = vadd.f32 1e-05, %v2186_v21 }
 0xa91   : > { %v2190_v18 = vmul.f32 %v2695_v3, %v2187_v19  ;;  %vm2196_vm13 = vweird.f32 %v2695_v3 }
 0xa92   : > { %2696 = vrsqrt.f32 %v2188_v22  ;;  %vm2197_vm15 = vmor %vm2195_vm14, %vm2196_vm13  ;;  %vm2205_vm0 = vweird.f32 %v2188_v22 }
 0xa93   : > { %v2191_v23 = vmul.f32 %v2695_v3, %v2190_v18 }
 0xa95   : > { %v2192_v24 = vmul.f32 0.5, %v2191_v23 }
 0xa97   : > { %v2193_v25 = vsub.f32 1.5, %v2192_v24 }
 0xa98   : > { %v2697_v26 = vpop.eup %2696 }
 0xa99   : > { %v2194_v60 = vmul.f32 %v2695_v3, %v2193_v25  ;;  %v2200_v56 = vmul.f32 %v2697_v26, %v2188_v22  ;;  %vm2206_vm1 = vweird.f32 %v2697_v26 }
 0xa9a   : > { %vm2207_vm3 = vmor %vm2205_vm0, %vm2206_vm1 }
 0xa9b   : > { %v2198_v63 = vsel %vm2197_vm15, %v2695_v3, %v2194_v60  ;;  %v2201_v27 = vmul.f32 %v2697_v26, %v2200_v56 }
 0xa9c   : > { %v2209_v29 = vmul.f32 %v2198_v63, %v2175_v8 }
 0xa9d   : > { %v2202_v30 = vmul.f32 0.5, %v2201_v27 }
 0xa9e   : > { %v2214_v55 = vmul.f32 %v2690_v13, %v2209_v29 }
 0xa9f   : > { %v2203_v6 = vsub.f32 1.5, %v2202_v30 }
 0xaa0   : > { %v2219_v31 = vadd.f32 %v2691_v28, %v2214_v55 }
 0xaa1   : > { %v2204_v32 = vmul.f32 %v2697_v26, %v2203_v6 }
 0xaa2   : > { %2221 = vst.msk [vmem:[#allocation8] sm:$0xff] %vm1932_vm2, %v2219_v31 }
 0xaa3   : > { %v2208_v9 = vsel %vm2207_vm3, %v2697_v26, %v2204_v32 }
 0xaa4   : > { %v2210_v33 = vmul.f32 %v2208_v9, %v2176_v14 }
 0xaa6   : > { %v2215_v34 = vmul.f32 %v2690_v13, %v2210_v33 }
 0xaa8   : > { %v2220_v12 = vadd.f32 %v2691_v28, %v2215_v34 }
 0xaaa   : > { %2222 = vst.msk [vmem:[#allocation8 + $0x8] sm:$0xff] %vm1932_vm2, %v2220_v12 }
 0xaab PF: > { %s3254_s12 = sadd.s32 4294967295, %s2752_s6   ;;  %s2233_s24 = sshll.u32 %s2953_s23, 4  ;;  %s2234_s24 = int_to_ptr.hbm [resolvable:$true] %s2233_s24 }
 0xaac   : > { %p3192_p7 = scmp.eq.s32.totalorder %s3254_s12, 3  ;;  %s2789_s11 = smov [#allocation8]  }
 0xaad   : > { %s2231_s15 = sshll.u32 %s2789_s11, 4  ;;  %s2712_s10 = sshra.s32 %s2234_s24, 4  ;;  %s2232_s15 = int_to_ptr.vmem [resolvable:$true] %s2231_s15  ;;  %s2713_s10 = int_to_ptr.hbm [resolvable:$true] %s2712_s10 }
 0xaae   : > { %s2714_s0 = scalar_lea.hbm %s2713_s10, 16  ;;  %s2718_s2 = scalar_lea.hbm %s2953_s23, 16 }
 0xaaf   : > { %p2715_p8 = scmp.ne.s32.totalorder %s2713_s10, %s2714_s0  ;;  %p2719_p11 = scmp.lt.s32.totalorder %s2713_s10, %s2953_s23 }
 0xab0   : > { %p2720_p12 = scmp.lt.s32.totalorder %s2718_s2, %s2714_s0 }
 0xab1   : > { %p2716_p9 = pnand %p2715_p8, %p3192_p7 }
 0xab2   : > { %p2721_p13 = por %p2720_p12, %p2719_p11 }
 0xab3   : > { %p2717_p10 = pneg %p2716_p9 }
 0xab5   : > { %p2722_p0 = pnand %p2721_p13, %p2717_p10 }
 0xab7   : > { %2725 = shalt.err (!%p2722_p0)
}
 0xab8   : > { %s2790_s12 = smov 128   ;;  %s2791_s3 = smov 8  }
 0xab9   : > { %2558 = dma.vmem_to_hbm [thread:$0]  (%p3192_p7), %s2232_s15, 256, %s2234_s24, [#allocation9], %s2790_s12, %s2790_s12, %s2791_s3  }
 0xaba   : > { %2739 = dma.done.wait (%p3192_p7), [#allocation9], 256  }
 0xabb   : > { %2741 = vsyncadd (%p3192_p7), [#allocation9], 4294967040 }
 0xabc PF: > { %s76_s6 = sadd.s32 1, %s2752_s6   ;;  %s3256_s12 = smov %s2748_s22 }
 0xabd   : > { %p73_p1 = scmp.ge.s32.totalorder %s76_s6, 6   ;;  %s3257_s22 = smov %s3259_s26 }
 0xabf   :  { %75 = sbr.rel (!%p73_p1) target bundleno = 48 (0x30), region = 223 }
 0xac4   :  { %2250 = vsyncpa [#allocation9], 1 }
 0xac5   :  { %2252 = vsyncpa [#allocation9 + $0x1], 1 }

</bundles_post_ra>
